<compile_context>
chip_gen: v5e
topology: v5e:2x2
jax: 0.10.0
libtpu: 0.0.40
codegen_flags: <defaults>
</compile_context>

<pallas_src>
import jax
import jax.numpy as jnp
from jax.experimental import pallas as pl
from jax.experimental.pallas import tpu as pltpu

EPS = 1e-5


def _num_tensorcores():
    """Best-effort TensorCore count per device (v7x=2, v5e/v6e=1)."""
    try:
        info = pltpu.get_tpu_info()
        for name in ("num_cores", "core_count", "num_tensorcores",
                     "tensorcore_count"):
            v = getattr(info, name, None)
            if isinstance(v, int) and v > 0:
                return v
    except Exception:
        pass
    try:
        v = getattr(jax.devices()[0], "num_cores", None)
        if isinstance(v, int) and v > 0:
            return v
    except Exception:
        pass
    return 1


def _make_kernel(c_tile, n_reduce):
    """Kernel over one (N, c_tile, L) channel block; gamma/beta resident (C,1)."""
    inv_n = 1.0 / float(n_reduce)

    def kernel(x_ref, skip_ref, gamma_ref, beta_ref, o_ref):
        # Slice this step's channels out of the resident (C, 1) params.
        c0 = pl.program_id(0) * c_tile
        if c_tile % 8 == 0:
            c0 = pl.multiple_of(c0, 8)
        g = gamma_ref[pl.ds(c0, c_tile), :]          # (c_tile, 1)
        b = beta_ref[pl.ds(c0, c_tile), :]           # (c_tile, 1)

        # Per-channel mean over N*H*W (lane reduce, then reduce over N).
        s1 = jnp.sum(jnp.sum(x_ref[...], axis=2, keepdims=True),
                     axis=0, keepdims=True)          # (1, c_tile, 1)
        mean = s1 * inv_n

        # Two-pass (numerically robust) biased variance, matching PyTorch
        # training-mode normalization.
        d = x_ref[...] - mean
        var = jnp.sum(jnp.sum(d * d, axis=2, keepdims=True),
                      axis=0, keepdims=True) * inv_n
        inv = jax.lax.rsqrt(var + EPS)

        # Fold per-channel constants; apply is 2 FMA-ish ops + 1 add per elem.
        scale = inv * g                              # (1, c_tile, 1)
        bias = b - mean * scale                      # (1, c_tile, 1)
        o_ref[...] = x_ref[...] * scale + bias + skip_ref[...]

    return kernel


def batchnorm_add(x75, x71, gamma, beta, *, num_cores=None):
    """Training-mode BatchNorm2d(x75; gamma, beta, eps=1e-5) + x71.

    x75, x71: (N, C, H, W) float32; gamma, beta: (C,). Returns (N, C, H, W).
    """
    N, C, H, W = x75.shape
    L = H * W
    n_reduce = N * L

    # Free reshapes (NCHW contiguous): no data movement, no transpose for any N.
    x3 = x75.reshape(N, C, L)
    s3 = x71.reshape(N, C, L)
    g2 = gamma.reshape(C, 1)
    b2 = beta.reshape(C, 1)

    if num_cores is None:
        num_cores = _num_tensorcores()

    # Grid selection:
    #  - single-TC (v5e/v6e): one full block; per-step overhead (~0.35us)
    #    exceeds the entire HBM time of this ~600 KB kernel, so don't split.
    #  - dual-TC (v7x): even 2-way channel split (multiple of 8 sublanes) so
    #    the "parallel" axis is sharded across both TensorCores.
    c_tile = C
    if num_cores >= 2 and C % 16 == 0:
        c_tile = C // 2
    # Insurance for large-C shapes: keep each per-array block under ~8 MiB.
    while N * c_tile * L * 4 > (8 << 20) and c_tile % 16 == 0:
        c_tile //= 2
    grid = (C // c_tile,)

    kernel = _make_kernel(c_tile, n_reduce)

    elems = N * C * L
    cost = pl.CostEstimate(
        flops=8 * elems,                 # stats (2 passes) + fused apply
        transcendentals=C,               # one rsqrt per channel
        bytes_accessed=3 * elems * 4 + 2 * C * 4,
    )

    out3 = pl.pallas_call(
        kernel,
        out_shape=jax.ShapeDtypeStruct((N, C, L), x75.dtype),
        grid=grid,
        in_specs=[
            pl.BlockSpec((N, c_tile, L), lambda i: (0, i, 0)),
            pl.BlockSpec((N, c_tile, L), lambda i: (0, i, 0)),
            # Resident params: constant block index -> DMA'd once, not per step.
            pl.BlockSpec((C, 1), lambda i: (0, 0)),
            pl.BlockSpec((C, 1), lambda i: (0, 0)),
        ],
        out_specs=pl.BlockSpec((N, c_tile, L), lambda i: (0, i, 0)),
        compiler_params=pltpu.CompilerParams(
            dimension_semantics=("parallel",)),
        cost_estimate=cost,
    )(x3, s3, g2, b2)

    return out3.reshape(N, C, H, W)


def _reference(x75, x71, gamma, beta):
    # Pure-JAX reference: training-mode BatchNorm2d (+affine) + add.
    mean = jnp.mean(x75, axis=(0, 2, 3), keepdims=True)
    var = jnp.var(x75, axis=(0, 2, 3), keepdims=True)
    g = gamma.reshape(1, -1, 1, 1)
    b = beta.reshape(1, -1, 1, 1)
    return (x75 - mean) * jax.lax.rsqrt(var + EPS) * g + b + x71


if __name__ == "__main__":
    key = jax.random.PRNGKey(0)
    k1, k2, k3, k4 = jax.random.split(key, 4)

    # Shapes implied by the module: x75, x71 = (1, 256, 14, 14), BN(256).
    N, C, H, W = 1, 256, 14, 14
    x75 = jax.random.normal(k1, (N, C, H, W), dtype=jnp.float32)
    x71 = jax.random.normal(k2, (N, C, H, W), dtype=jnp.float32)
    # PyTorch init is ones/zeros; use small random affine to exercise the path.
    gamma = 1.0 + 0.1 * jax.random.normal(k3, (C,), dtype=jnp.float32)
    beta = 0.1 * jax.random.normal(k4, (C,), dtype=jnp.float32)

    out = jax.block_until_ready(batchnorm_add(x75, x71, gamma, beta))
    ref = _reference(x75, x71, gamma, beta)
    assert out.shape == (N, C, H, W)
    assert jnp.allclose(out, ref, atol=1e-4, rtol=1e-4), "mismatch vs reference"

    # Also exercise the transpose-free N>1 path (stats over N*H*W per channel).
    n2, c2, h2, w2 = 2, 32, 8, 8
    a = jax.random.normal(k1, (n2, c2, h2, w2), dtype=jnp.float32)
    s = jax.random.normal(k2, (n2, c2, h2, w2), dtype=jnp.float32)
    g = 1.0 + 0.1 * jax.random.normal(k3, (c2,), dtype=jnp.float32)
    bb = 0.1 * jax.random.normal(k4, (c2,), dtype=jnp.float32)
    out2 = jax.block_until_ready(batchnorm_add(a, s, g, bb))
    assert jnp.allclose(out2, _reference(a, s, g, bb), atol=1e-4, rtol=1e-4), \
        "mismatch vs reference (N>1 path)"

    print("KERNEL_OK")
</pallas_src>

<mosaic_0001>
module attributes {stable_mosaic.version = 11 : i64} {
  func.func @kernel(%arg0: i32, %arg1: memref<1x256x196xf32, #tpu.memory_space<vmem>>, %arg2: memref<1x256x196xf32, #tpu.memory_space<vmem>>, %arg3: memref<256x1xf32, #tpu.memory_space<vmem>>, %arg4: memref<256x1xf32, #tpu.memory_space<vmem>>, %arg5: memref<1x256x196xf32, #tpu.memory_space<vmem>>) attributes {dimension_semantics = [#tpu.dimension_semantics<parallel>], iteration_bounds = array<i64: 1>, scalar_prefetch = 0 : i64, scratch_operands = 0 : i64, tpu.core_type = #tpu.core_type<tc>, window_params = [{transform_indices = @transform_0, window_bounds = array<i64: 1, 256, 196>}, {transform_indices = @transform_1, window_bounds = array<i64: 1, 256, 196>}, {pipeline_mode = #tpu.pipeline_mode<synchronous>, transform_indices = @transform_2, window_bounds = array<i64: 256, 1>}, {pipeline_mode = #tpu.pipeline_mode<synchronous>, transform_indices = @transform_3, window_bounds = array<i64: 256, 1>}, {transform_indices = @transform_4, window_bounds = array<i64: 1, 256, 196>}]} {
    %c256_i32 = arith.constant 256 : i32
    %0 = arith.muli %arg0, %c256_i32 : i32
    %1 = tpu.assume_multiple %0, 8 : i32
    %2 = arith.index_cast %1 : i32 to index
    %c0 = arith.constant 0 : index
    %3 = vector.load %arg3[%2, %c0] : memref<256x1xf32, #tpu.memory_space<vmem>>, vector<256x1xf32>
    %4 = arith.index_cast %1 : i32 to index
    %c0_0 = arith.constant 0 : index
    %5 = vector.load %arg4[%4, %c0_0] : memref<256x1xf32, #tpu.memory_space<vmem>>, vector<256x1xf32>
    %c0_1 = arith.constant 0 : index
    %c0_2 = arith.constant 0 : index
    %c0_3 = arith.constant 0 : index
    %6 = vector.load %arg1[%c0_1, %c0_2, %c0_3] : memref<1x256x196xf32, #tpu.memory_space<vmem>>, vector<1x256x196xf32>
    %cst = arith.constant dense<0.000000e+00> : vector<1x256xf32>
    %7 = vector.multi_reduction <add>, %6, %cst [2] : vector<1x256x196xf32> to vector<1x256xf32>
    %8 = vector.shape_cast %7 : vector<1x256xf32> to vector<1x256x1xf32>
    %cst_4 = arith.constant dense<0.000000e+00> : vector<256x1xf32>
    %9 = vector.multi_reduction <add>, %8, %cst_4 [0] : vector<1x256x1xf32> to vector<256x1xf32>
    %10 = vector.shape_cast %9 : vector<256x1xf32> to vector<1x256x1xf32>
    %cst_5 = arith.constant 0.00510204071 : f32
    %11 = vector.broadcast %cst_5 : f32 to vector<1x256x1xf32>
    %12 = arith.mulf %10, %11 : vector<1x256x1xf32>
    %c0_6 = arith.constant 0 : index
    %c0_7 = arith.constant 0 : index
    %c0_8 = arith.constant 0 : index
    %13 = vector.load %arg1[%c0_6, %c0_7, %c0_8] : memref<1x256x196xf32, #tpu.memory_space<vmem>>, vector<1x256x196xf32>
    %14 = vector.broadcast %12 : vector<1x256x1xf32> to vector<1x256x196xf32>
    %15 = arith.subf %13, %14 : vector<1x256x196xf32>
    %16 = arith.mulf %15, %15 : vector<1x256x196xf32>
    %cst_9 = arith.constant dense<0.000000e+00> : vector<1x256xf32>
    %17 = vector.multi_reduction <add>, %16, %cst_9 [2] : vector<1x256x196xf32> to vector<1x256xf32>
    %18 = vector.shape_cast %17 : vector<1x256xf32> to vector<1x256x1xf32>
    %cst_10 = arith.constant dense<0.000000e+00> : vector<256x1xf32>
    %19 = vector.multi_reduction <add>, %18, %cst_10 [0] : vector<1x256x1xf32> to vector<256x1xf32>
    %20 = vector.shape_cast %19 : vector<256x1xf32> to vector<1x256x1xf32>
    %cst_11 = arith.constant 0.00510204071 : f32
    %21 = vector.broadcast %cst_11 : f32 to vector<1x256x1xf32>
    %22 = arith.mulf %20, %21 : vector<1x256x1xf32>
    %cst_12 = arith.constant 9.99999974E-6 : f32
    %23 = vector.broadcast %cst_12 : f32 to vector<1x256x1xf32>
    %24 = arith.addf %22, %23 : vector<1x256x1xf32>
    %25 = math.rsqrt %24 : vector<1x256x1xf32>
    %26 = vector.shape_cast %3 : vector<256x1xf32> to vector<1x256x1xf32>
    %27 = arith.mulf %25, %26 : vector<1x256x1xf32>
    %28 = arith.mulf %12, %27 : vector<1x256x1xf32>
    %29 = vector.shape_cast %5 : vector<256x1xf32> to vector<1x256x1xf32>
    %30 = arith.subf %29, %28 : vector<1x256x1xf32>
    %c0_13 = arith.constant 0 : index
    %c0_14 = arith.constant 0 : index
    %c0_15 = arith.constant 0 : index
    %31 = vector.load %arg1[%c0_13, %c0_14, %c0_15] : memref<1x256x196xf32, #tpu.memory_space<vmem>>, vector<1x256x196xf32>
    %32 = vector.broadcast %27 : vector<1x256x1xf32> to vector<1x256x196xf32>
    %33 = arith.mulf %31, %32 : vector<1x256x196xf32>
    %34 = vector.broadcast %30 : vector<1x256x1xf32> to vector<1x256x196xf32>
    %35 = arith.addf %33, %34 : vector<1x256x196xf32>
    %c0_16 = arith.constant 0 : index
    %c0_17 = arith.constant 0 : index
    %c0_18 = arith.constant 0 : index
    %36 = vector.load %arg2[%c0_16, %c0_17, %c0_18] : memref<1x256x196xf32, #tpu.memory_space<vmem>>, vector<1x256x196xf32>
    %37 = arith.addf %35, %36 : vector<1x256x196xf32>
    %c0_19 = arith.constant 0 : index
    %c0_20 = arith.constant 0 : index
    %c0_21 = arith.constant 0 : index
    %38 = vector.load %arg5[%c0_19, %c0_20, %c0_21] : memref<1x256x196xf32, #tpu.memory_space<vmem>>, vector<1x256x196xf32>
    tpu.vector_store %arg5[%c0_19, %c0_20, %c0_21], %37 {strides = array<i32>} : memref<1x256x196xf32, #tpu.memory_space<vmem>>, vector<1x256x196xf32>,
    return
  }
  func.func @transform_0(%arg0: i32) -> (i32, i32, i32) {
    %c0_i32 = arith.constant 0 : i32
    %c0_i32_0 = arith.constant 0 : i32
    %c0_i32_1 = arith.constant 0 : i32
    return %c0_i32, %arg0, %c0_i32_0 : i32, i32, i32
  }
  func.func @transform_1(%arg0: i32) -> (i32, i32, i32) {
    %c0_i32 = arith.constant 0 : i32
    %c0_i32_0 = arith.constant 0 : i32
    %c0_i32_1 = arith.constant 0 : i32
    return %c0_i32, %arg0, %c0_i32_0 : i32, i32, i32
  }
  func.func @transform_2(%arg0: i32) -> (i32, i32) {
    %c0_i32 = arith.constant 0 : i32
    %c0_i32_0 = arith.constant 0 : i32
    %c0_i32_1 = arith.constant 0 : i32
    return %c0_i32, %c0_i32_0 : i32, i32
  }
  func.func @transform_3(%arg0: i32) -> (i32, i32) {
    %c0_i32 = arith.constant 0 : i32
    %c0_i32_0 = arith.constant 0 : i32
    %c0_i32_1 = arith.constant 0 : i32
    return %c0_i32, %c0_i32_0 : i32, i32
  }
  func.func @transform_4(%arg0: i32) -> (i32, i32, i32) {
    %c0_i32 = arith.constant 0 : i32
    %c0_i32_0 = arith.constant 0 : i32
    %c0_i32_1 = arith.constant 0 : i32
    return %c0_i32, %arg0, %c0_i32_0 : i32, i32, i32
  }
}

</mosaic_0001>

<bundles_post_ra>
// kernel: tpu_custom_call.1
= control target key start
LH: loop header
LB: loop body
LE: loop exit
PB: predicated region body
PF: predicated region fallthrough
CT: control target
= control target key end

     0   :  { %vm148_vm0 = vcmask 556032   ;;  %s4228_s0 = inlined_call_operand.vmem [shape: f32[1,256,196], index: 0, kind: input, shape index: {}]   ;;  %s4229_s2 = inlined_call_operand.vmem [shape: f32[256,1], index: 2, kind: input, shape index: {}]   ;;  %s4230_s3 = inlined_call_operand.vmem [shape: f32[256,1], index: 3, kind: input, shape index: {}]   ;;  %s4231_s1 = inlined_call_operand.vmem [shape: f32[1,256,196], index: 1, kind: input, shape index: {}]   ;;  %s4232_s4 = inlined_call_operand.vmem [shape: f32[1,256,196], index: 4, kind: output, shape index: {}]  }
   0x1   :  { %v1914_v0 = vld [vmem:[%s4228_s0 + $0x40] sm:$0xff]  ;;  %v1919_v1 = vld [vmem:[%s4228_s0 + $0x48] sm:$0xff]  ;;  %v1951_v10 = vld [vmem:[%s4228_s0 + $0x58] sm:$0xff] }
   0x2   :  { %v1924_v2 = vld [vmem:[%s4228_s0 + $0x20] sm:$0xff]  ;;  %v165_v3 = vsel %vm148_vm0, %v1919_v1, 0.0  ;;  %v1931_v4 = vld [vmem:[%s4228_s0 + $0x28] sm:$0xff]  ;;  %v1958_v13 = vld [vmem:[%s4228_s0 + $0x38] sm:$0xff]  ;;  %v169_v16 = vsel %vm148_vm0, %v1951_v10, 0.0 }
   0x3   :  { %v1936_v5 = vld [vmem:[%s4228_s0] sm:$0xff]  ;;  %v1941_v6 = vld [vmem:[%s4228_s0 + $0x8] sm:$0xff]  ;;  %v166_v7 = vadd.f32 %v165_v3, %v1914_v0  ;;  %v157_v8 = vsel %vm148_vm0, %v1931_v4, 0.0  ;;  %v1963_v14 = vld [vmem:[%s4228_s0 + $0x18] sm:$0xff]  ;;  %v161_v18 = vsel %vm148_vm0, %v1958_v13, 0.0 }
   0x4   :  { %v149_v9 = vsel %vm148_vm0, %v1941_v6, 0.0  ;;  %v158_v11 = vadd.f32 %v157_v8, %v1924_v2  ;;  %v1968_v15 = vld [vmem:[%s4228_s0 + $0x50] sm:$0xff]  ;;  %v153_v20 = vsel %vm148_vm0, %v1963_v14, 0.0  ;;  %v1992_v24 = vld [vmem:[%s4228_s0 + $0x88] sm:$0xff]  ;;  %v2002_v26 = vld [vmem:[%s4228_s0 + $0x78] sm:$0xff] }
   0x5   :  { %v150_v12 = vadd.f32 %v149_v9, %v1936_v5  ;;  %167 = vadd.xlane.f32.xlu2 %v166_v7  ;;  %v1975_v17 = vld [vmem:[%s4228_s0 + $0x30] sm:$0xff]  ;;  %v170_v21 = vadd.f32 %v169_v16, %v1968_v15  ;;  %v1997_v25 = vld [vmem:[%s4228_s0 + $0x68] sm:$0xff]  ;;  %v2007_v27 = vld [vmem:[%s4228_s0 + $0x80] sm:$0xff]  ;;  %v181_v28 = vsel %vm148_vm0, %v1992_v24, 0.0  ;;  %v177_v32 = vsel %vm148_vm0, %v2002_v26, 0.0 }
   0x6   :  { %159 = vadd.xlane.f32.xlu1 %v158_v11  ;;  %v1982_v19 = vld [vmem:[%s4228_s0 + $0x10] sm:$0xff]  ;;  %v162_v22 = vadd.f32 %v161_v18, %v1975_v17  ;;  %v2014_v29 = vld [vmem:[%s4228_s0 + $0x60] sm:$0xff]  ;;  %v173_v30 = vsel %vm148_vm0, %v1997_v25, 0.0  ;;  %v182_v33 = vadd.f32 %v181_v28, %v2007_v27  ;;  %v2031_v36 = vld [vmem:[%s4228_s0 + $0xb8] sm:$0xff] }
   0x7   :  { %151 = vadd.xlane.f32.xlu0 %v150_v12  ;;  %v154_v23 = vadd.f32 %v153_v20, %v1982_v19  ;;  %v2021_v31 = vld [vmem:[%s4228_s0 + $0x70] sm:$0xff]  ;;  %v174_v34 = vadd.f32 %v173_v30, %v2014_v29  ;;  %v2036_v37 = vld [vmem:[%s4228_s0 + $0x98] sm:$0xff]  ;;  %v2041_v38 = vld [vmem:[%s4228_s0 + $0xa8] sm:$0xff]  ;;  %v193_v40 = vsel %vm148_vm0, %v2031_v36, 0.0 }
   0x8   :  { %v178_v35 = vadd.f32 %v177_v32, %v2021_v31  ;;  %v2046_v39 = vld [vmem:[%s4228_s0 + $0xb0] sm:$0xff]  ;;  %v185_v42 = vsel %vm148_vm0, %v2036_v37, 0.0  ;;  %v2060_v43 = vld [vmem:[%s4228_s0 + $0xa0] sm:$0xff]  ;;  %v189_v44 = vsel %vm148_vm0, %v2041_v38, 0.0  ;;  %v2070_v48 = vld [vmem:[%s4228_s0 + $0xe8] sm:$0xff] }
   0x9   :  { %v2053_v41 = vld [vmem:[%s4228_s0 + $0x90] sm:$0xff]  ;;  %v194_v45 = vadd.f32 %v193_v40, %v2046_v39  ;;  %v190_v47 = vadd.f32 %v189_v44, %v2060_v43  ;;  %v2075_v49 = vld [vmem:[%s4228_s0 + $0xc8] sm:$0xff]  ;;  %v2080_v50 = vld [vmem:[%s4228_s0 + $0xd8] sm:$0xff]  ;;  %v205_v52 = vsel %vm148_vm0, %v2070_v48, 0.0 }
   0xa   :  { %v186_v46 = vadd.f32 %v185_v42, %v2053_v41  ;;  %v2085_v51 = vld [vmem:[%s4228_s0 + $0xe0] sm:$0xff]  ;;  %v197_v54 = vsel %vm148_vm0, %v2075_v49, 0.0  ;;  %v2099_v55 = vld [vmem:[%s4228_s0 + $0xd0] sm:$0xff]  ;;  %v201_v56 = vsel %vm148_vm0, %v2080_v50, 0.0  ;;  %v2109_v60 = vld [vmem:[%s4228_s0 + $0x118] sm:$0xff] }
   0xb   :  { %v2092_v53 = vld [vmem:[%s4228_s0 + $0xc0] sm:$0xff]  ;;  %v206_v57 = vadd.f32 %v205_v52, %v2085_v51  ;;  %v202_v59 = vadd.f32 %v201_v56, %v2099_v55  ;;  %v2114_v61 = vld [vmem:[%s4228_s0 + $0xf8] sm:$0xff]  ;;  %v2119_v62 = vld [vmem:[%s4228_s0 + $0x108] sm:$0xff]  ;;  %v217_v3 = vsel %vm148_vm0, %v2109_v60, 0.0 }
   0xc   :  { %v198_v58 = vadd.f32 %v197_v54, %v2092_v53  ;;  %v2124_v63 = vld [vmem:[%s4228_s0 + $0x110] sm:$0xff]  ;;  %v209_v8 = vsel %vm148_vm0, %v2114_v61, 0.0  ;;  %v2138_v9 = vld [vmem:[%s4228_s0 + $0x100] sm:$0xff]  ;;  %v213_v11 = vsel %vm148_vm0, %v2119_v62, 0.0  ;;  %v2148_v20 = vld [vmem:[%s4228_s0 + $0x148] sm:$0xff] }
   0xd   :  { %171 = vadd.xlane.f32.xlu2 %v170_v21  ;;  %v2131_v7 = vld [vmem:[%s4228_s0 + $0xf0] sm:$0xff]  ;;  %v218_v12 = vadd.f32 %v217_v3, %v2124_v63  ;;  %v214_v18 = vadd.f32 %v213_v11, %v2138_v9  ;;  %v2153_v21 = vld [vmem:[%s4228_s0 + $0x128] sm:$0xff]  ;;  %v229_v28 = vsel %vm148_vm0, %v2148_v20, 0.0  ;;  %v2170_v30 = vld [vmem:[%s4228_s0 + $0x120] sm:$0xff] }
   0xe   :  { %163 = vadd.xlane.f32.xlu1 %v162_v22  ;;  %v210_v16 = vadd.f32 %v209_v8, %v2131_v7  ;;  %v2158_v22 = vld [vmem:[%s4228_s0 + $0x138] sm:$0xff]  ;;  %v221_v32 = vsel %vm148_vm0, %v2153_v21, 0.0  ;;  %v2209_v54 = vld [vmem:[%s4228_s0 + $0x150] sm:$0xff]  ;;  %v2226_v11 = vld [vmem:[%s4228_s0 + $0x1a8] sm:$0xff] }
   0xf   :  { %155 = vadd.xlane.f32.xlu0 %v154_v23  ;;  %v2163_v23 = vld [vmem:[%s4228_s0 + $0x140] sm:$0xff]  ;;  %v222_v40 = vadd.f32 %v221_v32, %v2170_v30  ;;  %v2187_v44 = vld [vmem:[%s4228_s0 + $0x178] sm:$0xff]  ;;  %4278 = vst [vmem:[#allocation3_spill] sm:$0xff] %v2226_v11 }
  0x10   :  { %v241_v52 = vsel %vm148_vm0, %v2187_v44, 0.0  ;;  %v2248_v32 = vld [vmem:[%s4228_s0 + $0x180] sm:$0xff] }
  0x11   :  { %4282 = vst [vmem:[#allocation7_spill] sm:$0xff] %v2248_v32 }
  0x15   :  { %183 = vadd.xlane.f32.xlu2 %v182_v33  ;;  %v2177_v33 = vld [vmem:[%s4228_s0 + $0x130] sm:$0xff] }
  0x16   :  { %179 = vadd.xlane.f32.xlu1 %v178_v35  ;;  %v230_v35 = vadd.f32 %v229_v28, %v2163_v23  ;;  %v253_v28 = vsel %vm148_vm0, %v2226_v11, 0.0 }
  0x17   :  { %175 = vadd.xlane.f32.xlu0 %v174_v34  ;;  %v225_v34 = vsel %vm148_vm0, %v2158_v22, 0.0 }
  0x18   :  { %v226_v42 = vadd.f32 %v225_v34, %v2177_v33 }
  0x1d   :  { %195 = vadd.xlane.f32.xlu2 %v194_v45  ;;  %v2192_v45 = vld [vmem:[%s4228_s0 + $0x158] sm:$0xff] }
  0x1e   :  { %191 = vadd.xlane.f32.xlu1 %v190_v47  ;;  %v2202_v47 = vld [vmem:[%s4228_s0 + $0x170] sm:$0xff]  ;;  %v233_v56 = vsel %vm148_vm0, %v2192_v45, 0.0 }
  0x1f   :  { %187 = vadd.xlane.f32.xlu0 %v186_v46  ;;  %v2197_v46 = vld [vmem:[%s4228_s0 + $0x168] sm:$0xff]  ;;  %v234_v3 = vadd.f32 %v233_v56, %v2209_v54 }
  0x25   :  { %207 = vadd.xlane.f32.xlu2 %v206_v57  ;;  %v2216_v57 = vld [vmem:[%s4228_s0 + $0x160] sm:$0xff] }
  0x26   :  { %203 = vadd.xlane.f32.xlu1 %v202_v59  ;;  %4277 = vst [vmem:[#allocation2_spill] sm:$0xff] %v2216_v57  ;;  %v242_v59 = vadd.f32 %v241_v52, %v2202_v47 }
  0x27   :  { %199 = vadd.xlane.f32.xlu0 %v198_v58  ;;  %v237_v58 = vsel %vm148_vm0, %v2197_v46, 0.0 }
  0x28   :  { %v238_v8 = vadd.f32 %v237_v58, %v2216_v57  ;;  %v2265_v58 = vld [vmem:[%s4228_s0 + $0x1d8] sm:$0xff] }
  0x29   :  { %4284 = vst [vmem:[#allocation9_spill] sm:$0xff] %v2265_v58 }
  0x2d   :  { %219 = vadd.xlane.f32.xlu2 %v218_v12  ;;  %v2231_v12 = vld [vmem:[%s4228_s0 + $0x188] sm:$0xff] }
  0x2e   :  { %215 = vadd.xlane.f32.xlu1 %v214_v18  ;;  %4279 = vst [vmem:[#allocation4_spill] sm:$0xff] %v2231_v12  ;;  %v2241_v18 = vld [vmem:[%s4228_s0 + $0x1a0] sm:$0xff]  ;;  %v245_v34 = vsel %vm148_vm0, %v2231_v12, 0.0 }
  0x2f   :  { %211 = vadd.xlane.f32.xlu0 %v210_v16  ;;  %v2236_v16 = vld [vmem:[%s4228_s0 + $0x198] sm:$0xff]  ;;  %4281 = vst [vmem:[#allocation6_spill] sm:$0xff] %v2241_v18  ;;  %v246_v52 = vadd.f32 %v245_v34, %v2248_v32  ;;  %v2287_v34 = vld [vmem:[%s4228_s0 + $0x1b0] sm:$0xff] }
  0x30   :  { %4280 = vst [vmem:[#allocation5_spill] sm:$0xff] %v2236_v16 }
  0x31   :  { %4288 = vst [vmem:[#allocation13_spill] sm:$0xff] %v2287_v34 }
  0x35   :  { %231 = vadd.xlane.f32.xlu2 %v230_v35  ;;  %v2255_v35 = vld [vmem:[%s4228_s0 + $0x190] sm:$0xff] }
  0x36   :  { %227 = vadd.xlane.f32.xlu1 %v226_v42  ;;  %4283 = vst [vmem:[#allocation8_spill] sm:$0xff] %v2255_v35  ;;  %v254_v42 = vadd.f32 %v253_v28, %v2241_v18  ;;  %v265_v28 = vsel %vm148_vm0, %v2265_v58, 0.0 }
  0x37   :  { %223 = vadd.xlane.f32.xlu0 %v222_v40  ;;  %v249_v40 = vsel %vm148_vm0, %v2236_v16, 0.0  ;;  %v2304_v16 = vld [vmem:[%s4228_s0 + $0x1e8] sm:$0xff] }
  0x38   :  { %v250_v56 = vadd.f32 %v249_v40, %v2255_v35  ;;  %4290 = vst [vmem:[#allocation15_spill] sm:$0xff] %v2304_v16 }
  0x3d   :  { %243 = vadd.xlane.f32.xlu2 %v242_v59  ;;  %v2270_v59 = vld [vmem:[%s4228_s0 + $0x1b8] sm:$0xff] }
  0x3e   :  { %239 = vadd.xlane.f32.xlu1 %v238_v8  ;;  %4285 = vst [vmem:[#allocation10_spill] sm:$0xff] %v2270_v59  ;;  %v2280_v8 = vld [vmem:[%s4228_s0 + $0x1d0] sm:$0xff]  ;;  %v257_v40 = vsel %vm148_vm0, %v2270_v59, 0.0  ;;  %v2309_v59 = vld [vmem:[%s4228_s0 + $0x1f8] sm:$0xff] }
  0x3f   :  { %235 = vadd.xlane.f32.xlu0 %v234_v3  ;;  %v2275_v3 = vld [vmem:[%s4228_s0 + $0x1c8] sm:$0xff]  ;;  %4287 = vst [vmem:[#allocation12_spill] sm:$0xff] %v2280_v8  ;;  %v266_v35 = vadd.f32 %v265_v28, %v2280_v8  ;;  %v2314_v28 = vld [vmem:[%s4228_s0 + $0x1e0] sm:$0xff] }
  0x40   :  { %4286 = vst [vmem:[#allocation11_spill] sm:$0xff] %v2275_v3 }
  0x41   :  { %4291 = vst [vmem:[#allocation16_spill] sm:$0xff] %v2309_v59 }
  0x42   :  { %4292 = vst [vmem:[#allocation17_spill] sm:$0xff] %v2314_v28 }
  0x45   :  { %255 = vadd.xlane.f32.xlu2 %v254_v42  ;;  %v2294_v42 = vld [vmem:[%s4228_s0 + $0x1c0] sm:$0xff] }
  0x46   :  { %251 = vadd.xlane.f32.xlu1 %v250_v56  ;;  %4289 = vst [vmem:[#allocation14_spill] sm:$0xff] %v2294_v42  ;;  %v258_v56 = vadd.f32 %v257_v40, %v2287_v34  ;;  %v269_v40 = vsel %vm148_vm0, %v2304_v16, 0.0 }
  0x47   :  { %247 = vadd.xlane.f32.xlu0 %v246_v52  ;;  %v261_v52 = vsel %vm148_vm0, %v2275_v3, 0.0 }
  0x48   :  { %v262_v58 = vadd.f32 %v261_v52, %v2294_v42  ;;  %v2321_v52 = vld [vmem:[%s4228_s0 + $0x1f0] sm:$0xff]  ;;  %v273_v42 = vsel %vm148_vm0, %v2309_v59, 0.0 }
  0x49   :  { %4293 = vst [vmem:[#allocation18_spill] sm:$0xff] %v2321_v52 }
  0x4d   :  { %267 = vadd.xlane.f32.xlu2 %v266_v35  ;;  %v270_v35 = vadd.f32 %v269_v40, %v2314_v28 }
  0x4e   :  { %263 = vadd.xlane.f32.xlu1 %v262_v58  ;;  %v274_v58 = vadd.f32 %v273_v42, %v2321_v52 }
  0x4f   :  { %259 = vadd.xlane.f32.xlu0 %v258_v56 }
  0x56   :  { %275 = vadd.xlane.f32.xlu1 %v274_v58 }
  0x57   :  { %271 = vadd.xlane.f32.xlu0 %v270_v35 }
  0x78   :  { %v168_v56 = vpop.xlane.xlu2 %167 }
  0x79   :  { %v160_v3 = vpop.xlane.xlu1 %159  ;;  %v2341_v11 = vmul.f32 0.0051020407, %v168_v56 }
  0x7a   :  { %v152_v34 = vpop.xlane.xlu0 %151  ;;  %v2327_v8 = vmul.f32 0.0051020407, %v160_v3 }
  0x7b   :  { %v2329_v16 = vmul.f32 0.0051020407, %v152_v34 }
  0x7c   :  { %4294 = vst [vmem:[#allocation19_spill] sm:$0xff] %v2327_v8  ;;  %v345_v12 = vsub.f32 %v1924_v2, %v2327_v8  ;;  %v346_v32 = vsub.f32 %v1931_v4, %v2327_v8 }
  0x7d   :  { %v341_v40 = vsub.f32 %v1936_v5, %v2329_v16  ;;  %v342_v42 = vsub.f32 %v1941_v6, %v2329_v16 }
  0x7e   :  { %v409_v35 = vmul.f32 %v345_v12, %v345_v12  ;;  %v410_v58 = vmul.f32 %v346_v32, %v346_v32 }
  0x7f   :  { %v405_v52 = vmul.f32 %v341_v40, %v341_v40  ;;  %v406_v59 = vmul.f32 %v342_v42, %v342_v42 }
  0x80   :  { %v172_v3 = vpop.xlane.xlu2 %171  ;;  %v477_v34 = vsel %vm148_vm0, %v410_v58, 0.0 }
  0x81   :  { %v469_v28 = vsel %vm148_vm0, %v406_v59, 0.0  ;;  %v2343_v2 = vmul.f32 0.0051020407, %v172_v3  ;;  %v164_v4 = vpop.xlane.xlu1 %163  ;;  %v478_v18 = vadd.f32 %v477_v34, %v409_v35 }
  0x82   :  { %v156_v8 = vpop.xlane.xlu0 %155  ;;  %v470_v5 = vadd.f32 %v469_v28, %v405_v52  ;;  %v2345_v57 = vmul.f32 0.0051020407, %v164_v4 }
  0x83   :  { %v2347_v6 = vmul.f32 0.0051020407, %v156_v8  ;;  %479 = vadd.xlane.f32.xlu1 %v478_v18  ;;  %v351_v12 = vsub.f32 %v1968_v15, %v2343_v2  ;;  %v352_v32 = vsub.f32 %v1951_v10, %v2343_v2  ;;  %v350_v15 = vsub.f32 %v1919_v1, %v2341_v11 }
  0x84   :  { %471 = vadd.xlane.f32.xlu2 %v470_v5  ;;  %v347_v59 = vsub.f32 %v1975_v17, %v2345_v57  ;;  %v348_v56 = vsub.f32 %v1958_v13, %v2345_v57 }
  0x85   :  { %v343_v28 = vsub.f32 %v1982_v19, %v2347_v6  ;;  %v344_v8 = vsub.f32 %v1963_v14, %v2347_v6  ;;  %v415_v18 = vmul.f32 %v351_v12, %v351_v12  ;;  %v416_v52 = vmul.f32 %v352_v32, %v352_v32 }
  0x86   :  { %v411_v40 = vmul.f32 %v347_v59, %v347_v59  ;;  %v412_v42 = vmul.f32 %v348_v56, %v348_v56  ;;  %v349_v14 = vsub.f32 %v1914_v0, %v2341_v11  ;;  %v414_v32 = vmul.f32 %v350_v15, %v350_v15 }
  0x87   :  { %v407_v10 = vmul.f32 %v343_v28, %v343_v28  ;;  %v408_v35 = vmul.f32 %v344_v8, %v344_v8  ;;  %v489_v17 = vsel %vm148_vm0, %v416_v52, 0.0 }
  0x88   :  { %v184_v58 = vpop.xlane.xlu2 %183  ;;  %v490_v3 = vadd.f32 %v489_v17, %v415_v18  ;;  %v481_v13 = vsel %vm148_vm0, %v412_v42, 0.0  ;;  %v413_v0 = vmul.f32 %v349_v14, %v349_v14  ;;  %v485_v42 = vsel %vm148_vm0, %v414_v32, 0.0 }
  0x89   :  { %v473_v19 = vsel %vm148_vm0, %v408_v35, 0.0  ;;  %v2368_v34 = vmul.f32 0.0051020407, %v184_v58  ;;  %v482_v5 = vadd.f32 %v481_v13, %v411_v40  ;;  %v180_v12 = vpop.xlane.xlu1 %179 }
  0x8a   :  { %v176_v4 = vpop.xlane.xlu0 %175  ;;  %v474_v1 = vadd.f32 %v473_v19, %v407_v10  ;;  %v2372_v56 = vmul.f32 0.0051020407, %v180_v12 }
  0x8b   :  { %4295 = vst [vmem:[#allocation20_spill] sm:$0xff] %v2368_v34  ;;  %v2370_v59 = vmul.f32 0.0051020407, %v176_v4  ;;  %491 = vadd.xlane.f32.xlu1 %v490_v3  ;;  %v357_v28 = vsub.f32 %v2007_v27, %v2368_v34  ;;  %v358_v8 = vsub.f32 %v1992_v24, %v2368_v34  ;;  %v486_v3 = vadd.f32 %v485_v42, %v413_v0 }
  0x8c   :  { %483 = vadd.xlane.f32.xlu2 %v482_v5  ;;  %475 = vadd.xlane.f32.xlu0 %v474_v1  ;;  %v356_v10 = vsub.f32 %v2002_v26, %v2372_v56 }
  0x8d   :  { %v353_v18 = vsub.f32 %v2014_v29, %v2370_v59  ;;  %v354_v52 = vsub.f32 %v1997_v25, %v2370_v59  ;;  %v421_v15 = vmul.f32 %v357_v28, %v357_v28  ;;  %v422_v40 = vmul.f32 %v358_v8, %v358_v8 }
  0x8e   :  { %v355_v29 = vsub.f32 %v2021_v31, %v2372_v56  ;;  %v420_v5 = vmul.f32 %v356_v10, %v356_v10 }
  0x8f   :  { %v417_v35 = vmul.f32 %v353_v18, %v353_v18  ;;  %v418_v27 = vmul.f32 %v354_v52, %v354_v52  ;;  %v501_v17 = vsel %vm148_vm0, %v422_v40, 0.0 }
  0x90   :  { %v196_v24 = vpop.xlane.xlu2 %195  ;;  %v502_v58 = vadd.f32 %v501_v17, %v421_v15  ;;  %v419_v31 = vmul.f32 %v355_v29, %v355_v29  ;;  %v497_v52 = vsel %vm148_vm0, %v420_v5, 0.0 }
  0x91   :  { %v493_v13 = vsel %vm148_vm0, %v418_v27, 0.0  ;;  %v2389_v25 = vmul.f32 0.0051020407, %v196_v24  ;;  %v192_v4 = vpop.xlane.xlu1 %191 }
  0x92   :  { %v188_v19 = vpop.xlane.xlu0 %187  ;;  %v494_v14 = vadd.f32 %v493_v13, %v417_v35  ;;  %v2393_v26 = vmul.f32 0.0051020407, %v192_v4  ;;  %v498_v35 = vadd.f32 %v497_v52, %v419_v31 }
  0x93   :  { %4296 = vst [vmem:[#allocation21_spill] sm:$0xff] %v2389_v25  ;;  %v2391_v1 = vmul.f32 0.0051020407, %v188_v19  ;;  %503 = vadd.xlane.f32.xlu1 %v502_v58  ;;  %v363_v12 = vsub.f32 %v2046_v39, %v2389_v25  ;;  %v364_v32 = vsub.f32 %v2031_v36, %v2389_v25 }
  0x94   :  { %495 = vadd.xlane.f32.xlu2 %v494_v14  ;;  %487 = vadd.xlane.f32.xlu0 %v486_v3  ;;  %v362_v15 = vsub.f32 %v2041_v38, %v2393_v26 }
  0x95   :  { %v359_v28 = vsub.f32 %v2053_v41, %v2391_v1  ;;  %v360_v8 = vsub.f32 %v2036_v37, %v2391_v1  ;;  %v427_v0 = vmul.f32 %v363_v12, %v363_v12  ;;  %v428_v18 = vmul.f32 %v364_v32, %v364_v32 }
  0x96   :  { %v361_v41 = vsub.f32 %v2060_v43, %v2393_v26  ;;  %v426_v3 = vmul.f32 %v362_v15, %v362_v15 }
  0x97   :  { %v423_v40 = vmul.f32 %v359_v28, %v359_v28  ;;  %v424_v39 = vmul.f32 %v360_v8, %v360_v8  ;;  %v513_v42 = vsel %vm148_vm0, %v428_v18, 0.0 }
  0x98   :  { %v208_v36 = vpop.xlane.xlu2 %207  ;;  %v514_v10 = vadd.f32 %v513_v42, %v427_v0  ;;  %v425_v43 = vmul.f32 %v361_v41, %v361_v41  ;;  %v509_v32 = vsel %vm148_vm0, %v426_v3, 0.0 }
  0x99   :  { %v505_v27 = vsel %vm148_vm0, %v424_v39, 0.0  ;;  %v2410_v37 = vmul.f32 0.0051020407, %v208_v36  ;;  %v204_v58 = vpop.xlane.xlu1 %203 }
  0x9a   :  { %v200_v17 = vpop.xlane.xlu0 %199  ;;  %v506_v24 = vadd.f32 %v505_v27, %v423_v40  ;;  %v2414_v38 = vmul.f32 0.0051020407, %v204_v58  ;;  %v510_v18 = vadd.f32 %v509_v32, %v425_v43 }
  0x9b   :  { %4297 = vst [vmem:[#allocation22_spill] sm:$0xff] %v2410_v37  ;;  %v2412_v13 = vmul.f32 0.0051020407, %v200_v17  ;;  %515 = vadd.xlane.f32.xlu1 %v514_v10  ;;  %v369_v29 = vsub.f32 %v2085_v51, %v2410_v37  ;;  %v370_v19 = vsub.f32 %v2070_v48, %v2410_v37 }
  0x9c   :  { %507 = vadd.xlane.f32.xlu2 %v506_v24  ;;  %499 = vadd.xlane.f32.xlu0 %v498_v35  ;;  %v368_v31 = vsub.f32 %v2080_v50, %v2414_v38 }
  0x9d   :  { %4298 = vst [vmem:[#allocation23_spill] sm:$0xff] %v2412_v13  ;;  %v365_v14 = vsub.f32 %v2092_v53, %v2412_v13  ;;  %v366_v4 = vsub.f32 %v2075_v49, %v2412_v13  ;;  %v433_v5 = vmul.f32 %v369_v29, %v369_v29  ;;  %v434_v12 = vmul.f32 %v370_v19, %v370_v19 }
  0x9e   :  { %v367_v53 = vsub.f32 %v2099_v55, %v2414_v38  ;;  %v432_v42 = vmul.f32 %v368_v31, %v368_v31 }
  0x9f   :  { %v429_v28 = vmul.f32 %v365_v14, %v365_v14  ;;  %v430_v51 = vmul.f32 %v366_v4, %v366_v4  ;;  %v525_v8 = vsel %vm148_vm0, %v434_v12, 0.0 }
  0xa0   :  { %v220_v48 = vpop.xlane.xlu2 %219  ;;  %v526_v0 = vadd.f32 %v525_v8, %v433_v5  ;;  %v431_v55 = vmul.f32 %v367_v53, %v367_v53  ;;  %v521_v58 = vsel %vm148_vm0, %v432_v42, 0.0 }
  0xa1   :  { %v517_v52 = vsel %vm148_vm0, %v430_v51, 0.0  ;;  %v2431_v49 = vmul.f32 0.0051020407, %v220_v48  ;;  %v216_v39 = vpop.xlane.xlu1 %215 }
  0xa2   :  { %v212_v15 = vpop.xlane.xlu0 %211  ;;  %v518_v40 = vadd.f32 %v517_v52, %v429_v28  ;;  %v2435_v50 = vmul.f32 0.0051020407, %v216_v39  ;;  %v522_v14 = vadd.f32 %v521_v58, %v431_v55 }
  0xa3   :  { %4299 = vst [vmem:[#allocation24_spill] sm:$0xff] %v2431_v49  ;;  %v2433_v36 = vmul.f32 0.0051020407, %v212_v15  ;;  %527 = vadd.xlane.f32.xlu1 %v526_v0  ;;  %v375_v10 = vsub.f32 %v2124_v63, %v2431_v49  ;;  %v376_v35 = vsub.f32 %v2109_v60, %v2431_v49 }
  0xa4   :  { %4301 = vst [vmem:[#allocation26_spill] sm:$0xff] %v2435_v50  ;;  %519 = vadd.xlane.f32.xlu2 %v518_v40  ;;  %511 = vadd.xlane.f32.xlu0 %v510_v18  ;;  %v374_v3 = vsub.f32 %v2119_v62, %v2435_v50 }
  0xa5   :  { %4300 = vst [vmem:[#allocation25_spill] sm:$0xff] %v2433_v36  ;;  %v371_v27 = vsub.f32 %v2131_v7, %v2433_v36  ;;  %v372_v41 = vsub.f32 %v2114_v61, %v2433_v36  ;;  %v439_v17 = vmul.f32 %v375_v10, %v375_v10  ;;  %v440_v24 = vmul.f32 %v376_v35, %v376_v35 }
  0xa6   :  { %v373_v7 = vsub.f32 %v2138_v9, %v2435_v50  ;;  %v438_v31 = vmul.f32 %v374_v3, %v374_v3 }
  0xa7   :  { %v435_v29 = vmul.f32 %v371_v27, %v371_v27  ;;  %v436_v63 = vmul.f32 %v372_v41, %v372_v41  ;;  %v537_v19 = vsel %vm148_vm0, %v440_v24, 0.0 }
  0xa8   :  { %v232_v60 = vpop.xlane.xlu2 %231  ;;  %v538_v43 = vadd.f32 %v537_v19, %v439_v17  ;;  %v437_v9 = vmul.f32 %v373_v7, %v373_v7  ;;  %v533_v53 = vsel %vm148_vm0, %v438_v31, 0.0 }
  0xa9   :  { %v529_v4 = vsel %vm148_vm0, %v436_v63, 0.0  ;;  %v2452_v61 = vmul.f32 0.0051020407, %v232_v60  ;;  %v228_v32 = vpop.xlane.xlu1 %227 }
  0xaa   :  { %v224_v5 = vpop.xlane.xlu0 %223  ;;  %v530_v12 = vadd.f32 %v529_v4, %v435_v29  ;;  %v2456_v62 = vmul.f32 0.0051020407, %v228_v32  ;;  %v534_v10 = vadd.f32 %v533_v53, %v437_v9  ;;  %v4313_v53 = vld [vmem:[#allocation3_spill] sm:$0xff] }
  0xab   :  { %4302 = vst [vmem:[#allocation27_spill] sm:$0xff] %v2452_v61  ;;  %v2454_v28 = vmul.f32 0.0051020407, %v224_v5  ;;  %539 = vadd.xlane.f32.xlu1 %v538_v43  ;;  %v381_v51 = vsub.f32 %v2163_v23, %v2452_v61  ;;  %v382_v8 = vsub.f32 %v2148_v20, %v2452_v61 }
  0xac   :  { %4304 = vst [vmem:[#allocation29_spill] sm:$0xff] %v2456_v62  ;;  %531 = vadd.xlane.f32.xlu2 %v530_v12  ;;  %523 = vadd.xlane.f32.xlu0 %v522_v14  ;;  %v380_v15 = vsub.f32 %v2158_v22, %v2456_v62 }
  0xad   :  { %4303 = vst [vmem:[#allocation28_spill] sm:$0xff] %v2454_v28  ;;  %v377_v48 = vsub.f32 %v2170_v30, %v2454_v28  ;;  %v378_v0 = vsub.f32 %v2153_v21, %v2454_v28  ;;  %v445_v18 = vmul.f32 %v381_v51, %v381_v51  ;;  %v446_v52 = vmul.f32 %v382_v8, %v382_v8 }
  0xae   :  { %v379_v30 = vsub.f32 %v2177_v33, %v2456_v62  ;;  %v444_v17 = vmul.f32 %v380_v15, %v380_v15 }
  0xaf   :  { %v441_v40 = vmul.f32 %v377_v48, %v377_v48  ;;  %v442_v23 = vmul.f32 %v378_v0, %v378_v0  ;;  %v549_v39 = vsel %vm148_vm0, %v446_v52, 0.0 }
  0xb0   :  { %v244_v20 = vpop.xlane.xlu2 %243  ;;  %v550_v42 = vadd.f32 %v549_v39, %v445_v18  ;;  %v443_v33 = vmul.f32 %v379_v30, %v379_v30  ;;  %v545_v43 = vsel %vm148_vm0, %v444_v17, 0.0  ;;  %v4312_v18 = vld [vmem:[#allocation6_spill] sm:$0xff] }
  0xb1   :  { %v541_v35 = vsel %vm148_vm0, %v442_v23, 0.0  ;;  %v2473_v21 = vmul.f32 0.0051020407, %v244_v20  ;;  %v240_v41 = vpop.xlane.xlu1 %239  ;;  %v4314_v23 = vld [vmem:[#allocation7_spill] sm:$0xff]  ;;  %v4315_v20 = vld [vmem:[#allocation4_spill] sm:$0xff] }
  0xb2   :  { %v236_v55 = vpop.xlane.xlu0 %235  ;;  %v542_v27 = vadd.f32 %v541_v35, %v441_v40  ;;  %v2477_v22 = vmul.f32 0.0051020407, %v240_v41  ;;  %v546_v12 = vadd.f32 %v545_v43, %v443_v33 }
  0xb3   :  { %4305 = vst [vmem:[#allocation30_spill] sm:$0xff] %v2473_v21  ;;  %v2475_v24 = vmul.f32 0.0051020407, %v236_v55  ;;  %551 = vadd.xlane.f32.xlu1 %v550_v42  ;;  %v387_v58 = vsub.f32 %v2202_v47, %v2473_v21  ;;  %v388_v3 = vsub.f32 %v2187_v44, %v2473_v21  ;;  %v4316_v55 = vld [vmem:[#allocation5_spill] sm:$0xff] }
  0xb4   :  { %4307 = vst [vmem:[#allocation32_spill] sm:$0xff] %v2477_v22  ;;  %543 = vadd.xlane.f32.xlu2 %v542_v27  ;;  %535 = vadd.xlane.f32.xlu0 %v534_v10  ;;  %v386_v14 = vsub.f32 %v2197_v46, %v2477_v22 }
  0xb5   :  { %4306 = vst [vmem:[#allocation31_spill] sm:$0xff] %v2475_v24  ;;  %v383_v29 = vsub.f32 %v2209_v54, %v2475_v24  ;;  %v384_v63 = vsub.f32 %v2192_v45, %v2475_v24  ;;  %v451_v19 = vmul.f32 %v387_v58, %v387_v58  ;;  %v452_v60 = vmul.f32 %v388_v3, %v388_v3  ;;  %v4308_v54 = vld [vmem:[#allocation2_spill] sm:$0xff] }
  0xb6   :  { %v385_v31 = vsub.f32 %v4308_v54, %v2477_v22  ;;  %v450_v48 = vmul.f32 %v386_v14, %v386_v14  ;;  %v4322_v54 = vld [vmem:[#allocation9_spill] sm:$0xff] }
  0xb7   :  { %v447_v4 = vmul.f32 %v383_v29, %v383_v29  ;;  %v448_v47 = vmul.f32 %v384_v63, %v384_v63  ;;  %v561_v7 = vsel %vm148_vm0, %v452_v60, 0.0 }
  0xb8   :  { %v256_v44 = vpop.xlane.xlu2 %255  ;;  %v562_v5 = vadd.f32 %v561_v7, %v451_v19  ;;  %v449_v40 = vmul.f32 %v385_v31, %v385_v31  ;;  %v557_v30 = vsel %vm148_vm0, %v450_v48, 0.0  ;;  %v4317_v19 = vld [vmem:[#allocation8_spill] sm:$0xff]  ;;  %v4324_v48 = vld [vmem:[#allocation10_spill] sm:$0xff] }
  0xb9   :  { %v553_v32 = vsel %vm148_vm0, %v448_v47, 0.0  ;;  %v2494_v45 = vmul.f32 0.0051020407, %v256_v44  ;;  %v252_v9 = vpop.xlane.xlu1 %251 }
  0xba   :  { %v248_v51 = vpop.xlane.xlu0 %247  ;;  %v554_v8 = vadd.f32 %v553_v32, %v447_v4  ;;  %v2498_v46 = vmul.f32 0.0051020407, %v252_v9  ;;  %v558_v29 = vadd.f32 %v557_v30, %v449_v40  ;;  %v4325_v40 = vld [vmem:[#allocation11_spill] sm:$0xff] }
  0xbb   :  { %4309 = vst [vmem:[#allocation2_spill] sm:$0xff] %v2494_v45  ;;  %v2496_v0 = vmul.f32 0.0051020407, %v248_v51  ;;  %563 = vadd.xlane.f32.xlu1 %v562_v5  ;;  %v393_v52 = vsub.f32 %v4312_v18, %v2494_v45  ;;  %v394_v15 = vsub.f32 %v4313_v53, %v2494_v45 }
  0xbc   :  { %4311 = vst [vmem:[#allocation34_spill] sm:$0xff] %v2498_v46  ;;  %555 = vadd.xlane.f32.xlu2 %v554_v8  ;;  %547 = vadd.xlane.f32.xlu0 %v546_v12  ;;  %v392_v27 = vsub.f32 %v4316_v55, %v2498_v46  ;;  %v391_v60 = vsub.f32 %v4317_v19, %v2498_v46  ;;  %v4321_v12 = vld [vmem:[#allocation12_spill] sm:$0xff]  ;;  %v4323_v8 = vld [vmem:[#allocation13_spill] sm:$0xff]  ;;  %v4326_v55 = vld [vmem:[#allocation14_spill] sm:$0xff] }
  0xbd   :  { %4310 = vst [vmem:[#allocation33_spill] sm:$0xff] %v2496_v0  ;;  %v389_v39 = vsub.f32 %v4314_v23, %v2496_v0  ;;  %v390_v42 = vsub.f32 %v4315_v20, %v2496_v0  ;;  %v457_v10 = vmul.f32 %v393_v52, %v393_v52  ;;  %v458_v35 = vmul.f32 %v394_v15, %v394_v15  ;;  %v4329_v19 = vld [vmem:[#allocation17_spill] sm:$0xff] }
  0xbe   :  { %v456_v7 = vmul.f32 %v392_v27, %v392_v27  ;;  %v455_v51 = vmul.f32 %v391_v60, %v391_v60 }
  0xbf   :  { %v453_v41 = vmul.f32 %v389_v39, %v389_v39  ;;  %v454_v17 = vmul.f32 %v390_v42, %v390_v42  ;;  %v573_v58 = vsel %vm148_vm0, %v458_v35, 0.0 }
  0xc0   :  { %v268_v3 = vpop.xlane.xlu2 %267  ;;  %v574_v33 = vadd.f32 %v573_v58, %v457_v10  ;;  %v569_v15 = vsel %vm148_vm0, %v456_v7, 0.0  ;;  %v4331_v7 = vld [vmem:[#allocation16_spill] sm:$0xff] }
  0xc1   :  { %v565_v63 = vsel %vm148_vm0, %v454_v17, 0.0  ;;  %v2515_v43 = vmul.f32 0.0051020407, %v268_v3  ;;  %v264_v47 = vpop.xlane.xlu1 %263  ;;  %v570_v35 = vadd.f32 %v569_v15, %v455_v51 }
  0xc2   :  { %v260_v14 = vpop.xlane.xlu0 %259  ;;  %v566_v4 = vadd.f32 %v565_v63, %v453_v41  ;;  %v2519_v5 = vmul.f32 0.0051020407, %v264_v47 }
  0xc3   :  { %4318 = vst [vmem:[#allocation6_spill] sm:$0xff] %v2515_v43  ;;  %v2517_v44 = vmul.f32 0.0051020407, %v260_v14  ;;  %575 = vadd.xlane.f32.xlu1 %v574_v33  ;;  %v399_v32 = vsub.f32 %v4321_v12, %v2515_v43  ;;  %v400_v31 = vsub.f32 %v4322_v54, %v2515_v43  ;;  %v4330_v14 = vld [vmem:[#allocation15_spill] sm:$0xff] }
  0xc4   :  { %4320 = vst [vmem:[#allocation7_spill] sm:$0xff] %v2519_v5  ;;  %567 = vadd.xlane.f32.xlu2 %v566_v4  ;;  %559 = vadd.xlane.f32.xlu0 %v558_v29  ;;  %v398_v23 = vsub.f32 %v4325_v40, %v2519_v5  ;;  %v397_v27 = vsub.f32 %v4326_v55, %v2519_v5  ;;  %v1885_v40 = vmov 0  }
  0xc5   :  { %4319 = vst [vmem:[#allocation3_spill] sm:$0xff] %v2517_v44  ;;  %v395_v9 = vsub.f32 %v4323_v8, %v2517_v44  ;;  %v396_v18 = vsub.f32 %v4324_v48, %v2517_v44  ;;  %v463_v52 = vmul.f32 %v399_v32, %v399_v32  ;;  %v464_v53 = vmul.f32 %v400_v31, %v400_v31  ;;  %v4332_v8 = vld [vmem:[#allocation18_spill] sm:$0xff] }
  0xc6   :  { %v462_v3 = vmul.f32 %v398_v23, %v398_v23  ;;  %v461_v63 = vmul.f32 %v397_v27, %v397_v27  ;;  %1756 = vset.pattern.permute.xlu0 %v1885_v40  ;;  %1754 = vset.pattern.permute.xlu1 %v1885_v40 }
  0xc7   :  { %v459_v39 = vmul.f32 %v395_v9, %v395_v9  ;;  %v460_v20 = vmul.f32 %v396_v18, %v396_v18  ;;  %v585_v42 = vsel %vm148_vm0, %v464_v53, 0.0  ;;  %1755 = vset.pattern.permute.xlu2 %v1885_v40 }
  0xc8   :  { %v586_v10 = vadd.f32 %v585_v42, %v463_v52  ;;  %v581_v47 = vsel %vm148_vm0, %v462_v3, 0.0 }
  0xc9   :  { %v577_v30 = vsel %vm148_vm0, %v460_v20, 0.0  ;;  %v276_v58 = vpop.xlane.xlu1 %275  ;;  %v582_v31 = vadd.f32 %v581_v47, %v461_v63 }
  0xca   :  { %v272_v41 = vpop.xlane.xlu0 %271  ;;  %v578_v17 = vadd.f32 %v577_v30, %v459_v39  ;;  %v2538_v29 = vmul.f32 0.0051020407, %v276_v58 }
  0xcb   :  { %v2536_v33 = vmul.f32 0.0051020407, %v272_v41  ;;  %587 = vadd.xlane.f32.xlu1 %v586_v10 }
  0xcc   :  { %4328 = vst [vmem:[#allocation5_spill] sm:$0xff] %v2538_v29  ;;  %579 = vadd.xlane.f32.xlu2 %v578_v17  ;;  %571 = vadd.xlane.f32.xlu0 %v570_v35  ;;  %v404_v12 = vsub.f32 %v4331_v7, %v2538_v29  ;;  %v403_v9 = vsub.f32 %v4332_v8, %v2538_v29 }
  0xcd   :  { %4327 = vst [vmem:[#allocation4_spill] sm:$0xff] %v2536_v33  ;;  %v401_v60 = vsub.f32 %v4329_v19, %v2536_v33  ;;  %v402_v4 = vsub.f32 %v4330_v14, %v2536_v33 }
  0xce   :  { %v468_v18 = vmul.f32 %v404_v12, %v404_v12  ;;  %v467_v52 = vmul.f32 %v403_v9, %v403_v9 }
  0xcf   :  { %v465_v32 = vmul.f32 %v401_v60, %v401_v60  ;;  %v466_v54 = vmul.f32 %v402_v4, %v402_v4 }
  0xd0   :  { %v593_v53 = vsel %vm148_vm0, %v468_v18, 0.0 }
  0xd1   :  { %v589_v51 = vsel %vm148_vm0, %v466_v54, 0.0  ;;  %v594_v15 = vadd.f32 %v593_v53, %v467_v52 }
  0xd2   :  { %v590_v48 = vadd.f32 %v589_v51, %v465_v32 }
  0xd4   :  { %591 = vadd.xlane.f32.xlu2 %v590_v48  ;;  %583 = vadd.xlane.f32.xlu0 %v582_v31 }
  0xdc   :  { %595 = vadd.xlane.f32.xlu0 %v594_v15 }
  0xf6   :  { %v480_v23 = vpop.xlane.xlu1 %479 }
  0xf7   :  { %v472_v39 = vpop.xlane.xlu2 %471  ;;  %v631_v20 = vmul.f32 0.0051020407, %v480_v23 }
  0xf8   :  { %v629_v42 = vmul.f32 0.0051020407, %v472_v39 }
  0xf9   :  { %v663_v10 = vadd.f32 1e-05, %v631_v20 }
  0xfa   :  { %v661_v35 = vadd.f32 1e-05, %v629_v42  ;;  %v21_v42 = vld [vmem:[%s4229_s2 + $0x10] sm:$0xff] }
  0xfb   :  { %1757 = vrsqrt.f32 %v663_v10  ;;  %vm719_vm1 = vweird.f32 %v663_v10 }
  0xfc   :  { %1759 = vrsqrt.f32 %v661_v35  ;;  %vm699_vm5 = vweird.f32 %v661_v35 }
  0xfe   :  { %v492_v30 = vpop.xlane.xlu1 %491 }
  0xff   :  { %v484_v55 = vpop.xlane.xlu2 %483  ;;  %v476_v41 = vpop.xlane.xlu0 %475  ;;  %v634_v17 = vmul.f32 0.0051020407, %v492_v30 }
 0x100   :  { %v632_v27 = vmul.f32 0.0051020407, %v484_v55  ;;  %v630_v58 = vmul.f32 0.0051020407, %v476_v41 }
 0x101   :  { %v1758_v3 = vpop.eup %1757  ;;  %v2555_v7 = vadd.f32 1e-05, %v634_v17 }
 0x102   :  { %v2551_v63 = vadd.f32 1e-05, %v632_v27  ;;  %v1760_v19 = vpop.eup %1759  ;;  %v714_v60 = vmul.f32 %v1758_v3, %v663_v10  ;;  %v2553_v14 = vadd.f32 1e-05, %v630_v58  ;;  %vm720_vm2 = vweird.f32 %v1758_v3  ;;  %v19_v58 = vld [vmem:[%s4229_s2] sm:$0xff] }
 0x103   :  { %v694_v4 = vmul.f32 %v1760_v19, %v661_v35  ;;  %vm700_vm3 = vweird.f32 %v1760_v19  ;;  %vm2570_vm4 = vmor %vm719_vm1, %vm720_vm2  ;;  %vm749_vm13 = vweird.f32 %v2555_v7 }
 0x104   :  { %v715_v47 = vmul.f32 %v1758_v3, %v714_v60  ;;  %1761 = vrsqrt.f32 %v2551_v63  ;;  %vm701_vm6 = vmor %vm699_vm5, %vm700_vm3  ;;  %vm709_vm8 = vweird.f32 %v2553_v14  ;;  %vm729_vm10 = vweird.f32 %v2551_v63 }
 0x105   :  { %v695_v12 = vmul.f32 %v1760_v19, %v694_v4  ;;  %1763 = vrsqrt.f32 %v2553_v14 }
 0x106   :  { %v716_v32 = vmul.f32 0.5, %v715_v47  ;;  %v504_v54 = vpop.xlane.xlu1 %503  ;;  %1765 = vrsqrt.f32 %v2555_v7 }
 0x107   :  { %v496_v31 = vpop.xlane.xlu2 %495  ;;  %v696_v51 = vmul.f32 0.5, %v695_v12  ;;  %v488_v8 = vpop.xlane.xlu0 %487  ;;  %v637_v47 = vmul.f32 0.0051020407, %v504_v54 }
 0x108   :  { %v717_v9 = vsub.f32 1.5, %v716_v32  ;;  %v633_v48 = vmul.f32 0.0051020407, %v488_v8  ;;  %v635_v39 = vmul.f32 0.0051020407, %v496_v31 }
 0x109   :  { %v697_v52 = vsub.f32 1.5, %v696_v51 }
 0x10a   :  { %v2560_v18 = vpop.eup %1761  ;;  %v2562_v53 = vadd.f32 1e-05, %v633_v48  ;;  %v718_v15 = vmul.f32 %v1758_v3, %v717_v9  ;;  %v2583_v35 = vadd.f32 1e-05, %v635_v39 }
 0x10b   :  { %v1764_v40 = vpop.eup %1763  ;;  %v724_v23 = vmul.f32 %v2560_v18, %v2551_v63  ;;  %v698_v60 = vmul.f32 %v1760_v19, %v697_v52  ;;  %vm730_vm11 = vweird.f32 %v2560_v18  ;;  %v22_v63 = vld [vmem:[%s4229_s2 + $0x18] sm:$0xff] }
 0x10c   :  { %v704_v20 = vmul.f32 %v1764_v40, %v2553_v14  ;;  %1767 = vrsqrt.f32 %v2562_v53  ;;  %v2575_v30 = vpop.eup %1765  ;;  %v722_v4 = vsel %vm2570_vm4, %v1758_v3, %v718_v15  ;;  %v2596_v15 = vadd.f32 1e-05, %v637_v47  ;;  %vm2637_vm14 = vmor %vm729_vm10, %vm730_vm11 }
 0x10d   :  { %v725_v55 = vmul.f32 %v2560_v18, %v724_v23  ;;  %v2585_v31 = vmul.f32 %v722_v4, %v21_v42  ;;  %v702_v8 = vsel %vm701_vm6, %v1760_v19, %v698_v60  ;;  %v744_v9 = vmul.f32 %v2575_v30, %v2555_v7 }
 0x10e   :  { %v705_v27 = vmul.f32 %v1764_v40, %v704_v20  ;;  %v516_v41 = vpop.xlane.xlu1 %515  ;;  %v2591_v23 = vmul.f32 %v702_v8, %v19_v58  ;;  %1769 = vrsqrt.f32 %v2583_v35  ;;  %vm710_vm7 = vweird.f32 %v1764_v40 }
 0x10f   :  { %v508_v17 = vpop.xlane.xlu2 %507  ;;  %v500_v32 = vpop.xlane.xlu0 %499  ;;  %1121 = vperm.xlu0 %1756, %v2585_v31   ;;  %v726_v3 = vmul.f32 0.5, %v725_v55  ;;  %v745_v39 = vmul.f32 %v2575_v30, %v744_v9  ;;  %vm711_vm9 = vmor %vm709_vm8, %vm710_vm7  ;;  %v640_v60 = vmul.f32 0.0051020407, %v516_v41  ;;  %vm739_vm15 = vweird.f32 %v2562_v53 }
 0x110   :  { %v638_v12 = vmul.f32 0.0051020407, %v508_v17  ;;  %v706_v51 = vmul.f32 0.5, %v705_v27  ;;  %1111 = vperm.xlu1 %1754, %v2591_v23   ;;  %v636_v10 = vmul.f32 0.0051020407, %v500_v32  ;;  %v20_v17 = vld [vmem:[%s4229_s2 + $0x8] sm:$0xff]  ;;  %vm750_vm2 = vweird.f32 %v2575_v30 }
 0x111   :  { %v727_v20 = vsub.f32 1.5, %v726_v3  ;;  %v746_v3 = vmul.f32 0.5, %v745_v39  ;;  %vm2675_vm3 = vmor %vm749_vm13, %vm750_vm2  ;;  %vm779_vm7 = vweird.f32 %v2596_v15  ;;  %vm759_vm8 = vweird.f32 %v2583_v35 }
 0x112   :  { %v2589_v48 = vadd.f32 1e-05, %v638_v12  ;;  %v707_v52 = vsub.f32 1.5, %v706_v51  ;;  %v2594_v54 = vpop.eup %1767 }
 0x113   :  { %v734_v19 = vmul.f32 %v2594_v54, %v2562_v53  ;;  %v728_v41 = vmul.f32 %v2560_v18, %v727_v20  ;;  %vm740_vm12 = vweird.f32 %v2594_v54 }
 0x114   :  { %1771 = vrsqrt.f32 %v2589_v48  ;;  %v708_v58 = vmul.f32 %v1764_v40, %v707_v52  ;;  %v2610_v14 = vpop.eup %1769  ;;  %vm741_vm1 = vmor %vm739_vm15, %vm740_vm12  ;;  %vm789_vm4 = vweird.f32 %v2589_v48 }
 0x115   :  { %v735_v42 = vmul.f32 %v2594_v54, %v734_v19  ;;  %1773 = vrsqrt.f32 %v2596_v15  ;;  %v2620_v19 = vadd.f32 1e-05, %v636_v10  ;;  %v754_v20 = vmul.f32 %v2610_v14, %v2583_v35 }
 0x116   :  { %v528_v55 = vpop.xlane.xlu1 %527  ;;  %v712_v51 = vsel %vm711_vm9, %v1764_v40, %v708_v58  ;;  %vm760_vm9 = vweird.f32 %v2610_v14 }
 0x117   :  { %v520_v27 = vpop.xlane.xlu2 %519  ;;  %v512_v47 = vpop.xlane.xlu0 %511  ;;  %v736_v12 = vmul.f32 0.5, %v735_v42  ;;  %v2616_v8 = vmul.f32 %v712_v51, %v20_v17  ;;  %v2623_v42 = vadd.f32 1e-05, %v640_v60  ;;  %v747_v17 = vsub.f32 1.5, %v746_v3  ;;  %vm761_vm12 = vmor %vm759_vm8, %vm760_vm9 }
 0x118   :  { %v641_v4 = vmul.f32 0.0051020407, %v520_v27  ;;  %v639_v3 = vmul.f32 0.0051020407, %v512_v47  ;;  %v755_v33 = vmul.f32 %v2610_v14, %v754_v20  ;;  %vm769_vm11 = vweird.f32 %v2620_v19 }
 0x119   :  { %v737_v52 = vsub.f32 1.5, %v736_v12  ;;  %1116 = vperm.xlu2 %1755, %v2616_v8   ;;  %v23_v12 = vld [vmem:[%s4229_s2 + $0x20] sm:$0xff] }
 0x11a   :  { %v2614_v32 = vadd.f32 1e-05, %v641_v4  ;;  %v2618_v9 = vpop.eup %1771  ;;  %v732_v4 = vsel %vm2637_vm14, %v2560_v18, %v728_v41  ;;  %v643_v41 = vmul.f32 0.0051020407, %v528_v55  ;;  %v2681_v55 = vadd.f32 1e-05, %v639_v3 }
 0x11b   :  { %v784_v40 = vmul.f32 %v2618_v9, %v2589_v48  ;;  %v2630_v27 = vpop.eup %1773  ;;  %v738_v53 = vmul.f32 %v2594_v54, %v737_v52  ;;  %v2666_v45 = vmul.f32 %v732_v4, %v22_v63  ;;  %vm790_vm5 = vweird.f32 %v2618_v9 }
 0x11c   :  { %1775 = vrsqrt.f32 %v2614_v32  ;;  %v774_v18 = vmul.f32 %v2630_v27, %v2596_v15  ;;  %v2689_v7 = vadd.f32 1e-05, %v643_v41  ;;  %v756_v4 = vmul.f32 0.5, %v755_v33  ;;  %v24_v41 = vld [vmem:[%s4229_s2 + $0x28] sm:$0xff]  ;;  %vm791_vm6 = vmor %vm789_vm4, %vm790_vm5 }
 0x11d   :  { %v785_v10 = vmul.f32 %v2618_v9, %v784_v40  ;;  %1777 = vrsqrt.f32 %v2620_v19  ;;  %v742_v39 = vsel %vm741_vm1, %v2594_v54, %v738_v53  ;;  %vm780_vm10 = vweird.f32 %v2630_v27 }
 0x11e   :  { %v540_v58 = vpop.xlane.xlu1 %539  ;;  %1779 = vrsqrt.f32 %v2623_v42  ;;  %v2668_v44 = vmul.f32 %v742_v39, %v23_v12  ;;  %v775_v63 = vmul.f32 %v2630_v27, %v774_v18  ;;  %v757_v5 = vsub.f32 1.5, %v756_v4  ;;  %vm2783_vm2 = vmor %vm779_vm7, %vm780_vm10 }
 0x11f   :  { %v532_v60 = vpop.xlane.xlu2 %531  ;;  %v786_v51 = vmul.f32 0.5, %v785_v10  ;;  %v524_v43 = vpop.xlane.xlu0 %523  ;;  %v646_v12 = vmul.f32 0.0051020407, %v540_v58  ;;  %vm819_vm13 = vweird.f32 %v2614_v32  ;;  %vm809_vm14 = vweird.f32 %v2623_v42 }
 0x120   :  { %v644_v40 = vmul.f32 0.0051020407, %v532_v60  ;;  %v748_v60 = vmul.f32 %v2575_v30, %v747_v17  ;;  %1131 = vperm.xlu1 %1754, %v2668_v44   ;;  %vm799_vm4 = vweird.f32 %v2681_v55  ;;  %vm839_vm8 = vweird.f32 %v2689_v7 }
 0x121   :  { %v787_v47 = vsub.f32 1.5, %v786_v51  ;;  %1126 = vperm.xlu2 %1755, %v2666_v45   ;;  %v642_v51 = vmul.f32 0.0051020407, %v524_v43  ;;  %v2715_v29 = vadd.f32 1e-05, %v646_v12 }
 0x122   :  { %v2664_v52 = vadd.f32 1e-05, %v644_v40  ;;  %v2670_v10 = vpop.eup %1775  ;;  %v28_v40 = vld [vmem:[%s4229_s2 + $0x48] sm:$0xff]  ;;  %v752_v18 = vsel %vm2675_vm3, %v2575_v30, %v748_v60 }
 0x123   :  { %v814_v54 = vmul.f32 %v2670_v10, %v2614_v32  ;;  %v2685_v20 = vpop.eup %1777  ;;  %v788_v39 = vmul.f32 %v2618_v9, %v787_v47  ;;  %v2721_v60 = vmul.f32 %v752_v18, %v24_v41  ;;  %v2725_v24 = vadd.f32 1e-05, %v642_v51  ;;  %v27_v32 = vld [vmem:[%s4229_s2 + $0x40] sm:$0xff] }
 0x124   :  { %1781 = vrsqrt.f32 %v2664_v52  ;;  %v2692_v17 = vpop.eup %1779  ;;  %v764_v43 = vmul.f32 %v2685_v20, %v2620_v19  ;;  %v758_v41 = vmul.f32 %v2610_v14, %v757_v5  ;;  %vm820_vm1 = vweird.f32 %v2670_v10 }
 0x125   :  { %v815_v53 = vmul.f32 %v2670_v10, %v814_v54  ;;  %1783 = vrsqrt.f32 %v2681_v55  ;;  %v804_v47 = vmul.f32 %v2692_v17, %v2623_v42  ;;  %v792_v21 = vsel %vm791_vm6, %v2618_v9, %v788_v39  ;;  %v25_v39 = vld [vmem:[%s4229_s2 + $0x30] sm:$0xff]  ;;  %vm821_vm5 = vmor %vm819_vm13, %vm820_vm1 }
 0x126   :  { %1785 = vrsqrt.f32 %v2689_v7  ;;  %v552_v54 = vpop.xlane.xlu1 %551  ;;  %v2719_v48 = vmul.f32 %v792_v21, %v28_v40  ;;  %v765_v46 = vmul.f32 %v2685_v20, %v764_v43  ;;  %vm810_vm15 = vweird.f32 %v2692_v17 }
 0x127   :  { %v544_v3 = vpop.xlane.xlu2 %543  ;;  %v536_v58 = vpop.xlane.xlu0 %535  ;;  %v816_v61 = vmul.f32 0.5, %v815_v53  ;;  %v649_v12 = vmul.f32 0.0051020407, %v552_v54  ;;  %v805_v21 = vmul.f32 %v2692_v17, %v804_v47  ;;  %vm770_vm3 = vweird.f32 %v2685_v20 }
 0x128   :  { %v647_v33 = vmul.f32 0.0051020407, %v544_v3  ;;  %4339 = vst [vmem:[#allocation8_spill] sm:$0xff] %v2719_v48  ;;  %v776_v3 = vmul.f32 0.5, %v775_v63  ;;  %1156 = vperm.xlu0 %1756, %v2719_v48   ;;  %v645_v4 = vmul.f32 0.0051020407, %v536_v58  ;;  %vm2811_vm6 = vmor %vm769_vm11, %vm770_vm3  ;;  %vm849_vm7 = vweird.f32 %v2664_v52 }
 0x129   :  { %1136 = vperm.xlu2 %1755, %v2721_v60   ;;  %v817_v40 = vsub.f32 1.5, %v816_v61  ;;  %v766_v43 = vmul.f32 0.5, %v765_v46  ;;  %v2754_v58 = vadd.f32 1e-05, %v649_v12  ;;  %v2756_v54 = vmul.f32 0.5, %v805_v21 }
 0x12a   :  { %v2717_v30 = vadd.f32 1e-05, %v647_v33  ;;  %v2723_v0 = vpop.eup %1781  ;;  %v777_v51 = vsub.f32 1.5, %v776_v3  ;;  %v762_v3 = vsel %vm761_vm12, %v2610_v14, %v758_v41  ;;  %v2764_v49 = vadd.f32 1e-05, %v645_v4  ;;  %vm2872_vm12 = vmor %vm809_vm14, %vm810_vm15 }
 0x12b   :  { %v844_v9 = vmul.f32 %v2723_v0, %v2664_v52  ;;  %v2737_v63 = vpop.eup %1783  ;;  %v2766_v46 = vmul.f32 %v762_v3, %v25_v39  ;;  %v818_v14 = vmul.f32 %v2670_v10, %v817_v40  ;;  %vm850_vm10 = vweird.f32 %v2723_v0 }
 0x12c   :  { %1787 = vrsqrt.f32 %v2717_v30  ;;  %v2742_v53 = vpop.eup %1785  ;;  %v794_v5 = vmul.f32 %v2737_v63, %v2681_v55  ;;  %v778_v41 = vmul.f32 %v2630_v27, %v777_v51  ;;  %vm800_vm11 = vweird.f32 %v2737_v63  ;;  %vm851_vm14 = vmor %vm849_vm7, %vm850_vm10 }
 0x12d   :  { %1789 = vrsqrt.f32 %v2715_v29  ;;  %v845_v33 = vmul.f32 %v2723_v0, %v844_v9  ;;  %v834_v35 = vmul.f32 %v2742_v53, %v2689_v7  ;;  %1141 = vperm.xlu1 %1754, %v2766_v46   ;;  %v822_v22 = vsel %vm821_vm5, %v2670_v10, %v818_v14  ;;  %vm2899_vm15 = vmor %vm799_vm4, %vm800_vm11 }
 0x12e   :  { %1791 = vrsqrt.f32 %v2725_v24  ;;  %v564_v21 = vpop.xlane.xlu1 %563  ;;  %v795_v51 = vmul.f32 %v2737_v63, %v794_v5  ;;  %vm840_vm9 = vweird.f32 %v2742_v53  ;;  %vm829_vm13 = vweird.f32 %v2725_v24 }
 0x12f   :  { %v556_v18 = vpop.xlane.xlu2 %555  ;;  %v548_v47 = vpop.xlane.xlu0 %547  ;;  %v846_v3 = vmul.f32 0.5, %v845_v33  ;;  %1793 = vrsqrt.f32 %v2754_v58  ;;  %v652_v5 = vmul.f32 0.0051020407, %v564_v21  ;;  %v782_v21 = vsel %vm2783_vm2, %v2630_v27, %v778_v41 }
 0x130   :  { %v650_v61 = vmul.f32 0.0051020407, %v556_v18  ;;  %v648_v18 = vmul.f32 0.0051020407, %v548_v47  ;;  %v835_v47 = vmul.f32 %v2742_v53, %v834_v35  ;;  %v796_v25 = vmul.f32 0.5, %v795_v51 }
 0x131   :  { %v847_v37 = vsub.f32 1.5, %v846_v3  ;;  %v2840_v13 = vadd.f32 1e-05, %v652_v5  ;;  %vm879_vm2 = vweird.f32 %v2717_v30  ;;  %vm869_vm4 = vweird.f32 %v2715_v29 }
 0x132   :  { %v2768_v9 = vadd.f32 1e-05, %v650_v61  ;;  %v2770_v12 = vpop.eup %1787  ;;  %v767_v61 = vsub.f32 1.5, %v766_v43  ;;  %v31_v43 = vld [vmem:[%s4229_s2 + $0x60] sm:$0xff]  ;;  %v2817_v35 = vadd.f32 1e-05, %v648_v18  ;;  %vm859_vm7 = vweird.f32 %v2764_v49 }
 0x133   :  { %v2777_v4 = vpop.eup %1789  ;;  %v874_v15 = vmul.f32 %v2770_v12, %v2717_v30  ;;  %v2828_v62 = vmul.f32 %v822_v22, %v31_v43  ;;  %v26_v18 = vld [vmem:[%s4229_s2 + $0x38] sm:$0xff]  ;;  %v2838_v3 = vmul.f32 0.5, %v835_v47  ;;  %v2843_v22 = vmul.f32 %v782_v21, %v27_v32 }
 0x134   :  { %v2790_v40 = vpop.eup %1791  ;;  %1795 = vrsqrt.f32 %v2768_v9  ;;  %v864_v33 = vmul.f32 %v2777_v4, %v2715_v29  ;;  %v768_v10 = vmul.f32 %v2685_v20, %v767_v61  ;;  %v848_v32 = vmul.f32 %v2723_v0, %v847_v37 }
 0x135   :  { %1797 = vrsqrt.f32 %v2764_v49  ;;  %v824_v36 = vmul.f32 %v2790_v40, %v2725_v24  ;;  %4344 = vst [vmem:[#allocation12_spill] sm:$0xff] %v2828_v62  ;;  %v875_v39 = vmul.f32 %v2770_v12, %v874_v15  ;;  %v2836_v41 = vpop.eup %1793  ;;  %1171 = vperm.xlu0 %1756, %v2828_v62   ;;  %1151 = vperm.xlu1 %1754, %v2843_v22   ;;  %vm830_vm1 = vweird.f32 %v2790_v40 }
 0x136   :  { %4345 = vst [vmem:[#allocation9_spill] sm:$0xff] %v2843_v22  ;;  %v772_v61 = vsel %vm2811_vm6, %v2685_v20, %v768_v10  ;;  %v865_v15 = vmul.f32 %v2777_v4, %v864_v33  ;;  %1799 = vrsqrt.f32 %v2817_v35  ;;  %v797_v33 = vsub.f32 1.5, %v796_v25  ;;  %v34_v25 = vld [vmem:[%s4229_s2 + $0x78] sm:$0xff]  ;;  %vm2955_vm6 = vmor %vm839_vm8, %vm840_vm9 }
 0x137   :  { %v568_v19 = vpop.xlane.xlu2 %567  ;;  %v560_v14 = vpop.xlane.xlu0 %559  ;;  %v2855_v43 = vmul.f32 %v772_v61, %v26_v18  ;;  %v825_v5 = vmul.f32 %v2790_v40, %v824_v36  ;;  %v876_v21 = vmul.f32 0.5, %v875_v39  ;;  %v837_v10 = vsub.f32 1.5, %v2838_v3  ;;  %vm2995_vm11 = vmor %vm829_vm13, %vm830_vm1 }
 0x138   :  { %v653_v27 = vmul.f32 0.0051020407, %v568_v19  ;;  %v576_v19 = vpop.xlane.xlu1 %575  ;;  %v651_v18 = vmul.f32 0.0051020407, %v560_v14  ;;  %1801 = vrsqrt.f32 %v2840_v13  ;;  %v2884_v37 = vmul.f32 0.5, %v865_v15  ;;  %v30_v15 = vld [vmem:[%s4229_s2 + $0x58] sm:$0xff] }
 0x139   :  { %1146 = vperm.xlu2 %1755, %v2855_v43   ;;  %v894_v42 = vmul.f32 %v2836_v41, %v2754_v58  ;;  %v2903_v3 = vmul.f32 0.5, %v825_v5  ;;  %v852_v61 = vsel %vm851_vm14, %v2723_v0, %v848_v32  ;;  %v4350_v62 = vsub.f32 1.5, %v2756_v54  ;;  %v29_v0 = vld [vmem:[%s4229_s2 + $0x50] sm:$0xff] }
 0x13a   :  { %v2848_v51 = vpop.eup %1795  ;;  %v2863_v20 = vadd.f32 1e-05, %v653_v27  ;;  %v877_v34 = vsub.f32 1.5, %v876_v21  ;;  %v2915_v48 = vadd.f32 1e-05, %v651_v18  ;;  %v2917_v5 = vmul.f32 %v852_v61, %v34_v25 }
 0x13b   :  { %v2857_v47 = vpop.eup %1797  ;;  %v904_v28 = vmul.f32 %v2848_v51, %v2768_v9  ;;  %v808_v50 = vmul.f32 %v2692_v17, %v4350_v62  ;;  %vm880_vm3 = vweird.f32 %v2770_v12  ;;  %v655_v32 = vmul.f32 0.0051020407, %v576_v19 }
 0x13c   :  { %v854_v14 = vmul.f32 %v2857_v47, %v2764_v49  ;;  %1803 = vrsqrt.f32 %v2863_v20  ;;  %v2913_v55 = vpop.eup %1799  ;;  %4351 = vst [vmem:[#allocation13_spill] sm:$0xff] %v2917_v5  ;;  %v895_v21 = vmul.f32 %v2836_v41, %v894_v42  ;;  %vm870_vm5 = vweird.f32 %v2777_v4  ;;  %vm2979_vm10 = vmor %vm879_vm2, %vm880_vm3  ;;  %v35_v49 = vld [vmem:[%s4229_s2 + $0x80] sm:$0xff] }
 0x13d   :  { %v905_v52 = vmul.f32 %v2848_v51, %v904_v28  ;;  %v798_v28 = vmul.f32 %v2737_v63, %v797_v33  ;;  %v812_v62 = vsel %vm2872_vm12, %v2692_v17, %v808_v50  ;;  %1186 = vperm.xlu0 %1756, %v2917_v5   ;;  %v884_v17 = vmul.f32 %v2913_v55, %v2817_v35 }
 0x13e   :  { %v855_v18 = vmul.f32 %v2857_v47, %v854_v14  ;;  %v2930_v25 = vmul.f32 %v812_v62, %v30_v15  ;;  %v2935_v61 = vpop.eup %1801  ;;  %1805 = vrsqrt.f32 %v2915_v48  ;;  %v878_v14 = vmul.f32 %v2770_v12, %v877_v34 }
 0x13f   :  { %v580_v39 = vpop.xlane.xlu2 %579  ;;  %v572_v22 = vpop.xlane.xlu0 %571  ;;  %v802_v33 = vsel %vm2899_vm15, %v2737_v63, %v798_v28  ;;  %v906_v50 = vmul.f32 0.5, %v905_v52  ;;  %v867_v52 = vsub.f32 1.5, %v2884_v37  ;;  %v827_v15 = vsub.f32 1.5, %v2903_v3  ;;  %vm3058_vm15 = vmor %vm869_vm4, %vm870_vm5 }
 0x140   :  { %v656_v54 = vmul.f32 0.0051020407, %v580_v39  ;;  %4352 = vst [vmem:[#allocation10_spill] sm:$0xff] %v2930_v25  ;;  %v2941_v19 = vmul.f32 %v802_v33, %v29_v0  ;;  %1166 = vperm.xlu1 %1754, %v2930_v25   ;;  %v654_v63 = vmul.f32 0.0051020407, %v572_v22  ;;  %v838_v39 = vmul.f32 %v2742_v53, %v837_v10  ;;  %v588_v7 = vpop.xlane.xlu1 %587  ;;  %v37_v10 = vld [vmem:[%s4229_s2 + $0x90] sm:$0xff] }
 0x141   :  { %v2962_v0 = vadd.f32 1e-05, %v655_v32  ;;  %v2967_v22 = vmul.f32 0.5, %v895_v21  ;;  %vm860_vm8 = vweird.f32 %v2857_v47  ;;  %vm909_vm9 = vweird.f32 %v2768_v9 }
 0x142   :  { %v2943_v36 = vadd.f32 1e-05, %v656_v54  ;;  %v2945_v42 = vpop.eup %1803  ;;  %1161 = vperm.xlu2 %1755, %v2941_v19   ;;  %v2983_v3 = vmul.f32 0.5, %v855_v18  ;;  %v924_v28 = vmul.f32 %v2935_v61, %v2840_v13  ;;  %v907_v32 = vsub.f32 1.5, %v906_v50  ;;  %v33_v54 = vld [vmem:[%s4229_s2 + $0x70] sm:$0xff]  ;;  %vm3083_vm4 = vmor %vm859_vm7, %vm860_vm8 }
 0x143   :  { %v934_v34 = vmul.f32 %v2945_v42, %v2863_v20  ;;  %v885_v18 = vmul.f32 %v2913_v55, %v884_v17  ;;  %v3000_v5 = vadd.f32 1e-05, %v654_v63  ;;  %v882_v50 = vsel %vm2979_vm10, %v2770_v12, %v878_v14  ;;  %v32_v17 = vld [vmem:[%s4229_s2 + $0x68] sm:$0xff] }
 0x144   :  { %1807 = vrsqrt.f32 %v2943_v36  ;;  %vm899_vm12 = vweird.f32 %v2754_v58  ;;  %vm900_vm2 = vweird.f32 %v2836_v41  ;;  %vm910_vm13 = vweird.f32 %v2848_v51  ;;  %v3018_v63 = vpop.eup %1805 }
 0x145   :  { %v935_v62 = vmul.f32 %v2945_v42, %v934_v34  ;;  %v842_v34 = vsel %vm2955_vm6, %v2742_v53, %v838_v39  ;;  %1809 = vrsqrt.f32 %v2962_v0  ;;  %v3012_v24 = vmul.f32 %v882_v50, %v37_v10  ;;  %vm3040_vm14 = vmor %vm909_vm9, %vm910_vm13 }
 0x146   :  { %v828_v12 = vmul.f32 %v2790_v40, %v827_v15  ;;  %v658_v53 = vmul.f32 0.0051020407, %v588_v7  ;;  %v3020_v39 = vmul.f32 %v842_v34, %v33_v54  ;;  %v897_v37 = vsub.f32 1.5, %v2967_v22  ;;  %vm3123_vm8 = vmor %vm899_vm12, %vm900_vm2 }
 0x147   :  { %v592_v21 = vpop.xlane.xlu2 %591  ;;  %v584_v33 = vpop.xlane.xlu0 %583  ;;  %v936_v14 = vmul.f32 0.5, %v935_v62  ;;  %vm889_vm1 = vweird.f32 %v2817_v35  ;;  %1201 = vperm.xlu0 %1756, %v3012_v24   ;;  %v908_v15 = vmul.f32 %v2848_v51, %v907_v32  ;;  %v857_v7 = vsub.f32 1.5, %v2983_v3 }
 0x148   :  { %v659_v27 = vmul.f32 0.0051020407, %v592_v21  ;;  %v832_v10 = vsel %vm2995_vm11, %v2790_v40, %v828_v12  ;;  %v657_v50 = vmul.f32 0.0051020407, %v584_v33  ;;  %v886_v62 = vmul.f32 0.5, %v885_v18  ;;  %1181 = vperm.xlu1 %1754, %v3020_v39   ;;  %v40_v21 = vld [vmem:[%s4229_s2 + $0xa8] sm:$0xff] }
 0x149   :  { %1811 = vrsqrt.f32 %v3000_v5  ;;  %v3034_v22 = vmul.f32 %v832_v10, %v32_v17  ;;  %v914_v32 = vmul.f32 %v3018_v63, %v2915_v48  ;;  %v868_v33 = vmul.f32 %v2777_v4, %v867_v52 }
 0x14a   :  { %v3029_v25 = vpop.eup %1807  ;;  %v3048_v54 = vadd.f32 1e-05, %v659_v27  ;;  %v925_v30 = vmul.f32 %v2935_v61, %v924_v28  ;;  %v937_v18 = vsub.f32 1.5, %v936_v14  ;;  %v3063_v34 = vadd.f32 1e-05, %v658_v53  ;;  %v36_v28 = vld [vmem:[%s4229_s2 + $0x88] sm:$0xff] }
 0x14b   :  { %v964_v3 = vmul.f32 %v3029_v25, %v2943_v36  ;;  %1176 = vperm.xlu2 %1755, %v3034_v22   ;;  %v912_v17 = vsel %vm3040_vm14, %v2848_v51, %v908_v15  ;;  %v3069_v52 = vpop.eup %1809  ;;  %vm890_vm3 = vweird.f32 %v2913_v55  ;;  %v3074_v12 = vadd.f32 1e-05, %v657_v50 }
 0x14c   :  { %1813 = vrsqrt.f32 %v3048_v54  ;;  %v887_v14 = vsub.f32 1.5, %v886_v62  ;;  %vm939_vm5 = vweird.f32 %v2863_v20  ;;  %vm940_vm6 = vweird.f32 %v2945_v42  ;;  %vm3146_vm10 = vmor %vm889_vm1, %vm890_vm3 }
 0x14d   :  { %v965_v29 = vmul.f32 %v3029_v25, %v964_v3  ;;  %v3089_v53 = vmul.f32 %v912_v17, %v40_v21  ;;  %v915_v27 = vmul.f32 %v3018_v63, %v914_v32  ;;  %v872_v50 = vsel %vm3058_vm15, %v2777_v4, %v868_v33  ;;  %vm3109_vm7 = vmor %vm939_vm5, %vm940_vm6 }
 0x14e   :  { %v858_v15 = vmul.f32 %v2857_v47, %v857_v7  ;;  %v926_v3 = vmul.f32 0.5, %v925_v30  ;;  %1815 = vrsqrt.f32 %v3063_v34  ;;  %v3102_v21 = vmul.f32 %v872_v50, %v36_v28 }
 0x14f   :  { %v966_v10 = vmul.f32 0.5, %v965_v29  ;;  %v596_v62 = vpop.xlane.xlu0 %595  ;;  %v3099_v40 = vpop.eup %1811  ;;  %v938_v32 = vmul.f32 %v2945_v42, %v937_v18  ;;  %v954_v9 = vmul.f32 %v3069_v52, %v2962_v0  ;;  %1817 = vrsqrt.f32 %v3074_v12  ;;  %1216 = vperm.xlu0 %1756, %v3089_v53  }
 0x150   :  { %v862_v7 = vsel %vm3083_vm4, %v2857_v47, %v858_v15  ;;  %v898_v33 = vmul.f32 %v2836_v41, %v897_v37  ;;  %1196 = vperm.xlu1 %1754, %v3102_v21   ;;  %v660_v17 = vmul.f32 0.0051020407, %v596_v62  ;;  %v43_v47 = vld [vmem:[%s4229_s2 + $0xc0] sm:$0xff]  ;;  %v916_v58 = vmul.f32 0.5, %v915_v27 }
 0x151   :  { %v967_v30 = vsub.f32 1.5, %v966_v10  ;;  %v3128_v18 = vmul.f32 %v862_v7, %v35_v49  ;;  %v942_v37 = vsel %vm3109_vm7, %v2945_v42, %v938_v32  ;;  %v944_v28 = vmul.f32 %v3099_v40, %v3000_v5  ;;  %v39_v49 = vld [vmem:[%s4229_s2 + $0xa0] sm:$0xff] }
 0x152   :  { %v3136_v29 = vpop.eup %1813  ;;  %v888_v51 = vmul.f32 %v2913_v55, %v887_v14  ;;  %v927_v10 = vsub.f32 1.5, %v926_v3  ;;  %vm929_vm9 = vweird.f32 %v2840_v13  ;;  %v955_v27 = vmul.f32 %v3069_v52, %v954_v9 }
 0x153   :  { %v994_v42 = vmul.f32 %v3136_v29, %v3048_v54  ;;  %1191 = vperm.xlu2 %1755, %v3128_v18   ;;  %vm969_vm11 = vweird.f32 %v2943_v36  ;;  %v3155_v14 = vmul.f32 %v942_v37, %v43_v47  ;;  %v902_v35 = vsel %vm3123_vm8, %v2836_v41, %v898_v33  ;;  %v38_v41 = vld [vmem:[%s4229_s2 + $0x98] sm:$0xff] }
 0x154   :  { %v3163_v15 = vpop.eup %1815  ;;  %vm970_vm12 = vweird.f32 %v3029_v25  ;;  %v3167_v3 = vadd.f32 1e-05, %v660_v17  ;;  %v968_v32 = vmul.f32 %v3029_v25, %v967_v30  ;;  %vm930_vm2 = vweird.f32 %v2935_v61 }
 0x155   :  { %v995_v62 = vmul.f32 %v3136_v29, %v994_v42  ;;  %v3170_v9 = vpop.eup %1817  ;;  %v917_v4 = vsub.f32 1.5, %v916_v58  ;;  %v945_v7 = vmul.f32 %v3099_v40, %v944_v28  ;;  %v892_v33 = vsel %vm3146_vm10, %v2913_v55, %v888_v51  ;;  %vm3190_vm14 = vmor %vm969_vm11, %vm970_vm12  ;;  %v46_v51 = vld [vmem:[%s4229_s2 + $0xd8] sm:$0xff] }
 0x156   :  { %vm919_vm13 = vweird.f32 %v2915_v48  ;;  %v3181_v17 = vmul.f32 %v902_v35, %v39_v49  ;;  %v956_v30 = vmul.f32 0.5, %v955_v27  ;;  %vm920_vm1 = vweird.f32 %v3018_v63  ;;  %vm3198_vm15 = vmor %vm929_vm9, %vm930_vm2  ;;  %v44_v27 = vld [vmem:[%s4229_s2 + $0xc8] sm:$0xff] }
 0x157   :  { %v996_v20 = vmul.f32 0.5, %v995_v62  ;;  %v984_v47 = vmul.f32 %v3163_v15, %v3063_v34  ;;  %1231 = vperm.xlu0 %1756, %v3155_v14   ;;  %v928_v55 = vmul.f32 %v2935_v61, %v927_v10  ;;  %1819 = vrsqrt.f32 %v3167_v3  ;;  %vm3219_vm3 = vmor %vm919_vm13, %vm920_vm1  ;;  %v42_v62 = vld [vmem:[%s4229_s2 + $0xb8] sm:$0xff] }
 0x158   :  { %1211 = vperm.xlu1 %1754, %v3181_v17   ;;  %v3204_v36 = vmul.f32 %v892_v33, %v38_v41  ;;  %v972_v10 = vsel %vm3190_vm14, %v3029_v25, %v968_v32  ;;  %v946_v13 = vmul.f32 0.5, %v945_v7  ;;  %v974_v50 = vmul.f32 %v3170_v9, %v3074_v12  ;;  %v41_v41 = vld [vmem:[%s4229_s2 + $0xb0] sm:$0xff] }
 0x159   :  { %v997_v28 = vsub.f32 1.5, %v996_v20  ;;  %v918_v42 = vmul.f32 %v3018_v63, %v917_v4  ;;  %v957_v49 = vsub.f32 1.5, %v956_v30  ;;  %v985_v35 = vmul.f32 %v3163_v15, %v984_v47 }
 0x15a   :  { %v3225_v25 = vmul.f32 %v972_v10, %v46_v51  ;;  %v932_v32 = vsel %vm3198_vm15, %v2935_v61, %v928_v55  ;;  %vm959_vm4 = vweird.f32 %v2962_v0  ;;  %vm999_vm5 = vweird.f32 %v3048_v54 }
 0x15b   :  { %1206 = vperm.xlu2 %1755, %v3204_v36   ;;  %vm1000_vm6 = vweird.f32 %v3136_v29  ;;  %v998_v48 = vmul.f32 %v3136_v29, %v997_v28  ;;  %vm960_vm7 = vweird.f32 %v3069_v52  ;;  %v947_v4 = vsub.f32 1.5, %v946_v13  ;;  %v45_v13 = vld [vmem:[%s4229_s2 + $0xd0] sm:$0xff]  ;;  %v59_v28 = vld [vmem:[%s4230_s3 + $0x38] sm:$0xff] }
 0x15c   :  { %v975_v7 = vmul.f32 %v3170_v9, %v974_v50  ;;  %v922_v61 = vsel %vm3219_vm3, %v3018_v63, %v918_v42  ;;  %v3247_v54 = vmul.f32 %v932_v32, %v42_v62  ;;  %v986_v20 = vmul.f32 0.5, %v985_v35  ;;  %vm1001_vm10 = vmor %vm999_vm5, %vm1000_vm6 }
 0x15d   :  { %v3245_v33 = vpop.eup %1819  ;;  %vm949_vm8 = vweird.f32 %v3000_v5  ;;  %vm950_vm9 = vweird.f32 %v3099_v40  ;;  %v958_v30 = vmul.f32 %v3069_v52, %v957_v49  ;;  %vm3255_vm11 = vmor %vm959_vm4, %vm960_vm7  ;;  %v3260_v63 = vmul.f32 %v922_v61, %v41_v41  ;;  %v49_v5 = vld [vmem:[%s4229_s2 + $0xf0] sm:$0xff] }
 0x15e   :  { %v1002_v37 = vsel %vm1001_vm10, %v3136_v29, %v998_v48  ;;  %v976_v55 = vmul.f32 0.5, %v975_v7  ;;  %v1004_v58 = vmul.f32 %v3245_v33, %v3167_v3  ;;  %v948_v0 = vmul.f32 %v3099_v40, %v947_v4  ;;  %vm3269_vm12 = vmor %vm949_vm8, %vm950_vm9  ;;  %v53_v48 = vld [vmem:[%s4230_s3 + $0x8] sm:$0xff] }
 0x15f   :  { %1246 = vperm.xlu0 %1756, %v3225_v25   ;;  %v987_v51 = vsub.f32 1.5, %v986_v20  ;;  %v3274_v10 = vmul.f32 %v1002_v37, %v49_v5  ;;  %v962_v29 = vsel %vm3255_vm11, %v3069_v52, %v958_v30  ;;  %vm989_vm2 = vweird.f32 %v3063_v34  ;;  %v48_v4 = vld [vmem:[%s4229_s2 + $0xe8] sm:$0xff]  ;;  %v52_v5 = vld [vmem:[%s4230_s3] sm:$0xff] }
 0x160   :  { %1226 = vperm.xlu1 %1754, %v3247_v54   ;;  %vm990_vm13 = vweird.f32 %v3163_v15  ;;  %v977_v50 = vsub.f32 1.5, %v976_v55  ;;  %v1005_v42 = vmul.f32 %v3245_v33, %v1004_v58  ;;  %v952_v49 = vsel %vm3269_vm12, %v3099_v40, %v948_v0 }
 0x161   :  { %v3291_v35 = vmul.f32 %v962_v29, %v45_v13  ;;  %vm979_vm1 = vweird.f32 %v3074_v12  ;;  %vm980_vm14 = vweird.f32 %v3170_v9  ;;  %v988_v34 = vmul.f32 %v3163_v15, %v987_v51  ;;  %vm3297_vm15 = vmor %vm989_vm2, %vm990_vm13  ;;  %v4383_v51 = vld [vmem:[#allocation19_spill] sm:$0xff] }
 0x162   :  { %v3302_v62 = vmul.f32 %v952_v49, %v44_v27  ;;  %v1006_v32 = vmul.f32 0.5, %v1005_v42  ;;  %v1046_v40 = vmul.f32 %v2616_v8, %v2347_v6  ;;  %v978_v12 = vmul.f32 %v3170_v9, %v977_v50  ;;  %vm981_vm3 = vmor %vm979_vm1, %vm980_vm14  ;;  %v47_v6 = vld [vmem:[%s4229_s2 + $0xe0] sm:$0xff]  ;;  %v58_v27 = vld [vmem:[%s4230_s3 + $0x30] sm:$0xff] }
 0x163   :  { %1221 = vperm.xlu2 %1755, %v3260_v63   ;;  %v992_v7 = vsel %vm3297_vm15, %v3163_v15, %v988_v34  ;;  %vm1009_vm4 = vweird.f32 %v3167_v3  ;;  %vm1010_vm5 = vweird.f32 %v3245_v33  ;;  %v1049_v15 = vmul.f32 %v2668_v44, %v2341_v11  ;;  %v56_v3 = vld [vmem:[%s4230_s3 + $0x20] sm:$0xff]  ;;  %v50_v11 = vld [vmem:[%s4229_s2 + $0xf8] sm:$0xff] }
 0x164   :  { %v1007_v41 = vsub.f32 1.5, %v1006_v32  ;;  %v1078_v61 = vsub.f32 %v53_v48, %v1046_v40  ;;  %v982_v8 = vsel %vm981_vm3, %v3170_v9, %v978_v12  ;;  %v3321_v20 = vmul.f32 %v992_v7, %v48_v4  ;;  %vm1011_vm6 = vmor %vm1009_vm4, %vm1010_vm5  ;;  %v4384_v32 = vld [vmem:[#allocation8_spill] sm:$0xff]  ;;  %v4386_v48 = vld [vmem:[#allocation9_spill] sm:$0xff] }
 0x165   :  { %v3326_v30 = vmul.f32 %v982_v8, %v47_v6  ;;  %v1045_v9 = vmul.f32 %v2591_v23, %v2329_v16  ;;  %v1081_v55 = vsub.f32 %v56_v3, %v1049_v15  ;;  %v1052_v23 = vmul.f32 %v2855_v43, %v2372_v56  ;;  %v54_v56 = vld [vmem:[%s4230_s3 + $0x10] sm:$0xff]  ;;  %v4388_v15 = vld [vmem:[#allocation23_spill] sm:$0xff]  ;;  %v68_v3 = vld [vmem:[%s4230_s3 + $0x80] sm:$0xff] }
 0x166   :  { %v1008_v47 = vmul.f32 %v3245_v33, %v1007_v41  ;;  %v1048_v0 = vmul.f32 %v2666_v45, %v2345_v57  ;;  %v1047_v13 = vmul.f32 %v2585_v31, %v4383_v51  ;;  %v1055_v45 = vmul.f32 %v2941_v19, %v2393_v26  ;;  %v62_v31 = vld [vmem:[%s4230_s3 + $0x50] sm:$0xff]  ;;  %v57_v26 = vld [vmem:[%s4230_s3 + $0x28] sm:$0xff]  ;;  %v4392_v51 = vld [vmem:[#allocation29_spill] sm:$0xff] }
 0x167   :  { %1261 = vperm.xlu0 %1756, %v3274_v10   ;;  %v1077_v58 = vsub.f32 %v52_v5, %v1045_v9  ;;  %v1084_v29 = vsub.f32 %v59_v28, %v1052_v23  ;;  %v1051_v42 = vmul.f32 %v2766_v46, %v2370_v59  ;;  %v1050_v49 = vmul.f32 %v2721_v60, %v2343_v2  ;;  %v65_v2 = vld [vmem:[%s4230_s3 + $0x68] sm:$0xff]  ;;  %v4385_v12 = vld [vmem:[#allocation20_spill] sm:$0xff]  ;;  %v64_v5 = vld [vmem:[%s4230_s3 + $0x60] sm:$0xff] }
 0x168   :  { %1241 = vperm.xlu1 %1754, %v3291_v35   ;;  %v1012_v44 = vsel %vm1011_vm6, %v3245_v33, %v1008_v47  ;;  %v55_v33 = vld [vmem:[%s4230_s3 + $0x18] sm:$0xff]  ;;  %v1079_v57 = vsub.f32 %v54_v56, %v1047_v13  ;;  %v1087_v34 = vsub.f32 %v62_v31, %v1055_v45  ;;  %v1058_v52 = vmul.f32 %v3034_v22, %v2414_v38  ;;  %v61_v60 = vld [vmem:[%s4230_s3 + $0x48] sm:$0xff]  ;;  %v60_v38 = vld [vmem:[%s4230_s3 + $0x40] sm:$0xff] }
 0x169   :  { %v3346_v16 = vmul.f32 %v1012_v44, %v50_v11  ;;  %v1080_v43 = vsub.f32 %v55_v33, %v1048_v0  ;;  %v1083_v19 = vsub.f32 %v58_v27, %v1051_v42  ;;  %v1082_v59 = vsub.f32 %v57_v26, %v1050_v49  ;;  %v4389_v47 = vld [vmem:[#allocation12_spill] sm:$0xff]  ;;  %v4391_v11 = vld [vmem:[#allocation10_spill] sm:$0xff]  ;;  %v63_v23 = vld [vmem:[%s4230_s3 + $0x58] sm:$0xff] }
 0x16a   :  { %v1054_v40 = vmul.f32 %v4384_v32, %v2391_v1  ;;  %v1053_v4 = vmul.f32 %v4386_v48, %v4385_v12  ;;  %v1090_v7 = vsub.f32 %v65_v2, %v1058_v52  ;;  %v1057_v9 = vmul.f32 %v4389_v47, %v4388_v15  ;;  %v4394_v56 = vld [vmem:[#allocation13_spill] sm:$0xff]  ;;  %v4395_v31 = vld [vmem:[#allocation22_spill] sm:$0xff]  ;;  %v4396_v52 = vld [vmem:[#allocation32_spill] sm:$0xff] }
 0x16b   :  { %1236 = vperm.xlu2 %1755, %v3302_v62   ;;  %v1064_v13 = vmul.f32 %v3204_v36, %v4392_v51  ;;  %v67_v42 = vld [vmem:[%s4230_s3 + $0x78] sm:$0xff]  ;;  %v1059_v27 = vmul.f32 %v3020_v39, %v4395_v31  ;;  %v66_v36 = vld [vmem:[%s4230_s3 + $0x70] sm:$0xff]  ;;  %v1067_v32 = vmul.f32 %v3260_v63, %v4396_v52  ;;  %v69_v63 = vld [vmem:[%s4230_s3 + $0x88] sm:$0xff] }
 0x16c   :  { %v1086_v22 = vsub.f32 %v61_v60, %v1054_v40  ;;  %v1085_v1 = vsub.f32 %v60_v38, %v1053_v4  ;;  %v1089_v0 = vsub.f32 %v64_v5, %v1057_v9  ;;  %v4397_v40 = vld [vmem:[#allocation28_spill] sm:$0xff]  ;;  %v4400_v15 = vld [vmem:[#allocation31_spill] sm:$0xff]  ;;  %v4403_v51 = vld [vmem:[#allocation33_spill] sm:$0xff] }
 0x16d   :  { %v1063_v39 = vmul.f32 %v3012_v24, %v4397_v40  ;;  %v74_v2 = vld [vmem:[%s4230_s3 + $0xb0] sm:$0xff]  ;;  %v77_v47 = vld [vmem:[%s4230_s3 + $0xc8] sm:$0xff]  ;;  %v83_v52 = vld [vmem:[%s4230_s3 + $0xf8] sm:$0xff] }
 0x16e   :  { %v70_v60 = vld [vmem:[%s4230_s3 + $0x90] sm:$0xff]  ;;  %v73_v9 = vld [vmem:[%s4230_s3 + $0xa8] sm:$0xff] }
 0x16f   :  { %1340 = vperm.xlu0 %1756, %v1078_v61   ;;  %v4387_v61 = vld [vmem:[#allocation26_spill] sm:$0xff]  ;;  %v4398_v48 = vld [vmem:[#allocation24_spill] sm:$0xff]  ;;  %v1095_v38 = vsub.f32 %v70_v60, %v1063_v39  ;;  %v4401_v5 = vld [vmem:[#allocation27_spill] sm:$0xff] }
 0x170   :  { %1256 = vperm.xlu1 %1754, %v3321_v20   ;;  %v1061_v6 = vmul.f32 %v3128_v18, %v4387_v61  ;;  %v1062_v4 = vmul.f32 %v3102_v21, %v4398_v48  ;;  %v4399_v61 = vld [vmem:[#allocation34_spill] sm:$0xff]  ;;  %v1066_v21 = vmul.f32 %v3089_v53, %v4400_v15  ;;  %v81_v15 = vld [vmem:[%s4230_s3 + $0xe8] sm:$0xff] }
 0x171   :  { %v4407_v39 = vld [vmem:[#allocation2_spill] sm:$0xff] }
 0x172   :  { %v1093_v18 = vsub.f32 %v68_v3, %v1061_v6  ;;  %v1070_v6 = vmul.f32 %v3302_v62, %v4399_v61  ;;  %v72_v62 = vld [vmem:[%s4230_s3 + $0xa0] sm:$0xff] }
 0x173   :  { %1251 = vperm.xlu2 %1755, %v3326_v30   ;;  %v3340_v37 = vpop.permute.xlu2 %1116  ;;  %v4409_v61 = vld [vmem:[#allocation6_spill] sm:$0xff] }
 0x177   :  { %1355 = vperm.xlu0 %1756, %v1081_v55   ;;  %v4390_v55 = vld [vmem:[#allocation21_spill] sm:$0xff] }
 0x178   :  { %1335 = vperm.xlu1 %1754, %v1077_v58   ;;  %v1056_v44 = vmul.f32 %v4391_v11, %v4390_v55  ;;  %v1065_v55 = vmul.f32 %v3181_v17, %v4401_v5  ;;  %v1102_v11 = vsub.f32 %v77_v47, %v1070_v6  ;;  %v1069_v17 = vmul.f32 %v3155_v14, %v4403_v51 }
 0x179   :  { %v1074_v6 = vmul.f32 %v3321_v20, %v4409_v61 }
 0x17a   :  { %v1088_v33 = vsub.f32 %v63_v23, %v1056_v44  ;;  %v1098_v44 = vsub.f32 %v73_v9, %v1066_v21  ;;  %v1097_v53 = vsub.f32 %v72_v62, %v1065_v55  ;;  %v4402_v23 = vld [vmem:[#allocation7_spill] sm:$0xff] }
 0x17b   :  { %1266 = vperm.xlu2 %1755, %v3346_v16   ;;  %v3364_v50 = vpop.permute.xlu2 %1126  ;;  %v1106_v47 = vsub.f32 %v81_v15, %v1074_v6 }
 0x17f   :  { %1370 = vperm.xlu0 %1756, %v1084_v29   ;;  %v4393_v29 = vld [vmem:[#allocation25_spill] sm:$0xff] }
 0x180   :  { %1350 = vperm.xlu1 %1754, %v1080_v43   ;;  %v1060_v43 = vmul.f32 %v4394_v56, %v4393_v29  ;;  %v76_v29 = vld [vmem:[%s4230_s3 + $0xc0] sm:$0xff] }
 0x181   :  { %v3414_v58 = vpop.permute.xlu0 %1121  ;;  %v1101_v31 = vsub.f32 %v76_v29, %v1069_v17  ;;  %v1561_v17 = vld [vmem:[%s4231_s1 + $0x20] sm:$0xff] }
 0x182   :  { %v3398_v41 = vpop.permute.xlu1 %1111  ;;  %v1092_v26 = vsub.f32 %v67_v42, %v1060_v43  ;;  %v4404_v43 = vld [vmem:[#allocation30_spill] sm:$0xff]  ;;  %v75_v42 = vld [vmem:[%s4230_s3 + $0xb8] sm:$0xff] }
 0x183   :  { %1345 = vperm.xlu2 %1755, %v1079_v57   ;;  %v3381_v46 = vpop.permute.xlu2 %1136  ;;  %v71_v57 = vld [vmem:[%s4230_s3 + $0x98] sm:$0xff] }
 0x184   :  { %v1096_v49 = vsub.f32 %v71_v57, %v1064_v13  ;;  %v80_v13 = vld [vmem:[%s4230_s3 + $0xe0] sm:$0xff]  ;;  %v1068_v57 = vmul.f32 %v3247_v54, %v4404_v43 }
 0x186   :  { %v1100_v14 = vsub.f32 %v75_v42, %v1068_v57 }
 0x187   :  { %1385 = vperm.xlu0 %1756, %v1087_v34  }
 0x188   :  { %1365 = vperm.xlu1 %1754, %v1083_v19   ;;  %v1091_v19 = vsub.f32 %v66_v36, %v1059_v27 }
 0x18b   :  { %1360 = vperm.xlu2 %1755, %v1082_v59  }
 0x18f   :  { %1400 = vperm.xlu0 %1756, %v1090_v7   ;;  %v1099_v7 = vsub.f32 %v74_v2, %v1067_v32  ;;  %v79_v32 = vld [vmem:[%s4230_s3 + $0xd8] sm:$0xff]  ;;  %v1071_v2 = vmul.f32 %v3291_v35, %v4407_v39  ;;  %v82_v35 = vld [vmem:[%s4230_s3 + $0xf0] sm:$0xff] }
 0x190   :  { %1380 = vperm.xlu1 %1754, %v1086_v22   ;;  %v1094_v22 = vsub.f32 %v69_v63, %v1062_v4  ;;  %v4408_v63 = vld [vmem:[#allocation4_spill] sm:$0xff] }
 0x191   :  { %v1825_v39 = vld [vmem:[%s4228_s0 + $0x50] sm:$0xff] }
 0x192   :  { %v3419_v28 = vpop.permute.xlu1 %1131 }
 0x193   :  { %1375 = vperm.xlu2 %1755, %v1085_v1   ;;  %v3402_v8 = vpop.permute.xlu2 %1146 }
 0x197   :  { %1415 = vperm.xlu0 %1756, %v1093_v18  }
 0x198   :  { %1395 = vperm.xlu1 %1754, %v1089_v0   ;;  %v1073_v0 = vmul.f32 %v3326_v30, %v4402_v23 }
 0x19a   :  { %v3438_v34 = vpop.permute.xlu0 %1156  ;;  %v1105_v30 = vsub.f32 %v80_v13, %v1073_v0  ;;  %v1822_v0 = vld [vmem:[%s4228_s0 + $0x28] sm:$0xff] }
 0x19b   :  { %1390 = vperm.xlu2 %1755, %v1088_v33   ;;  %v1274_v51 = vmul.f32 %v1822_v0, %v3414_v58  ;;  %v1562_v13 = vld [vmem:[%s4231_s1 + $0x28] sm:$0xff] }
 0x19c   :  { %v3428_v45 = vpop.permute.xlu2 %1161  ;;  %v1829_v0 = vld [vmem:[%s4228_s0 + $0x8] sm:$0xff] }
 0x19f   :  { %1430 = vperm.xlu0 %1756, %v1096_v49   ;;  %v3440_v59 = vpop.permute.xlu1 %1141  ;;  %v4405_v49 = vld [vmem:[#allocation5_spill] sm:$0xff] }
 0x1a0   :  { %1410 = vperm.xlu1 %1754, %v1092_v26   ;;  %v1076_v36 = vmul.f32 %v3346_v16, %v4405_v49  ;;  %v78_v16 = vld [vmem:[%s4230_s3 + $0xd0] sm:$0xff] }
 0x1a2   :  { %v1108_v60 = vsub.f32 %v83_v52, %v1076_v36  ;;  %v1559_v36 = vld [vmem:[%s4231_s1 + $0x10] sm:$0xff] }
 0x1a3   :  { %1405 = vperm.xlu2 %1755, %v1091_v19   ;;  %v4406_v19 = vld [vmem:[#allocation3_spill] sm:$0xff] }
 0x1a4   :  { %v1072_v54 = vmul.f32 %v3225_v25, %v4406_v19  ;;  %v1103_v25 = vsub.f32 %v78_v16, %v1071_v2  ;;  %v1560_v19 = vld [vmem:[%s4231_s1 + $0x18] sm:$0xff]  ;;  %v1279_v2 = vmul.f32 %v1825_v39, %v3381_v46  ;;  %v1566_v39 = vld [vmem:[%s4231_s1 + $0x48] sm:$0xff] }
 0x1a5   :  { %v3452_v12 = vpop.permute.xlu2 %1176  ;;  %v1826_v16 = vld [vmem:[%s4228_s0 + $0x58] sm:$0xff] }
 0x1a6   :  { %v1104_v48 = vsub.f32 %v79_v32, %v1072_v54 }
 0x1a7   :  { %1445 = vperm.xlu0 %1756, %v1099_v7   ;;  %v3459_v24 = vpop.permute.xlu0 %1171  ;;  %v3461_v1 = vpop.permute.xlu1 %1151 }
 0x1a8   :  { %1425 = vperm.xlu1 %1754, %v1095_v38   ;;  %v1075_v38 = vmul.f32 %v3274_v10, %v4408_v63 }
 0x1aa   :  { %v1107_v21 = vsub.f32 %v82_v35, %v1075_v38 }
 0x1ab   :  { %1420 = vperm.xlu2 %1755, %v1094_v22  }
 0x1ad   :  { %v3473_v3 = vpop.permute.xlu2 %1191 }
 0x1af   :  { %1460 = vperm.xlu0 %1756, %v1102_v11   ;;  %v3480_v18 = vpop.permute.xlu0 %1186 }
 0x1b0   :  { %1440 = vperm.xlu1 %1754, %v1098_v44  }
 0x1b2   :  { %v3484_v33 = vpop.permute.xlu1 %1166 }
 0x1b3   :  { %1435 = vperm.xlu2 %1755, %v1097_v53   ;;  %v1821_v53 = vld [vmem:[%s4228_s0 + $0x20] sm:$0xff] }
 0x1b4   :  { %v1273_v23 = vmul.f32 %v1821_v53, %v3414_v58  ;;  %v1824_v58 = vld [vmem:[%s4228_s0 + $0x18] sm:$0xff]  ;;  %v1828_v53 = vld [vmem:[%s4228_s0] sm:$0xff] }
 0x1b5   :  { %v3494_v56 = vpop.permute.xlu2 %1206  ;;  %v1272_v49 = vmul.f32 %v1824_v58, %v3340_v37 }
 0x1b7   :  { %1475 = vperm.xlu0 %1756, %v1105_v30  }
 0x1b8   :  { %1455 = vperm.xlu1 %1754, %v1101_v31   ;;  %v1823_v31 = vld [vmem:[%s4228_s0 + $0x10] sm:$0xff] }
 0x1b9   :  { %v3501_v27 = vpop.permute.xlu0 %1201 }
 0x1ba   :  { %v3505_v26 = vpop.permute.xlu1 %1181 }
 0x1bb   :  { %1450 = vperm.xlu2 %1755, %v1100_v14   ;;  %v1271_v14 = vmul.f32 %v1823_v31, %v3340_v37 }
 0x1bd   :  { %v3515_v40 = vpop.permute.xlu2 %1221 }
 0x1bf   :  { %1490 = vperm.xlu0 %1756, %v1108_v60   ;;  %v1280_v60 = vmul.f32 %v1826_v16, %v3381_v46  ;;  %v1827_v46 = vld [vmem:[%s4228_s0 + $0x40] sm:$0xff] }
 0x1c0   :  { %1470 = vperm.xlu1 %1754, %v1104_v48   ;;  %v1567_v48 = vld [vmem:[%s4231_s1 + $0x50] sm:$0xff] }
 0x1c1   :  { %v3522_v4 = vpop.permute.xlu0 %1216 }
 0x1c2   :  { %v3524_v7 = vpop.permute.xlu1 %1196 }
 0x1c3   :  { %1465 = vperm.xlu2 %1755, %v1103_v25   ;;  %v1568_v25 = vld [vmem:[%s4231_s1 + $0x58] sm:$0xff] }
 0x1c5   :  { %v3531_v22 = vpop.permute.xlu2 %1236 }
 0x1c8   :  { %1485 = vperm.xlu1 %1754, %v1107_v21  }
 0x1c9   :  { %v3538_v9 = vpop.permute.xlu0 %1231 }
 0x1ca   :  { %v3540_v10 = vpop.permute.xlu1 %1211 }
 0x1cb   :  { %1480 = vperm.xlu2 %1755, %v1106_v47   ;;  %v1277_v47 = vmul.f32 %v1827_v46, %v3419_v28 }
 0x1cd   :  { %v3542_v5 = vpop.permute.xlu2 %1251 }
 0x1d1   :  { %v3544_v55 = vpop.permute.xlu0 %1246 }
 0x1d2   :  { %v3546_v11 = vpop.permute.xlu1 %1226 }
 0x1d5   :  { %v3548_v62 = vpop.permute.xlu2 %1266 }
 0x1d9   :  { %v3550_v20 = vpop.permute.xlu0 %1261 }
 0x1da   :  { %v3552_v44 = vpop.permute.xlu1 %1241 }
 0x1dd   :  { %v1346_v29 = vpop.permute.xlu2 %1345 }
 0x1de   :  { %v1497_v43 = vadd.f32 %v1346_v29, %v1273_v23  ;;  %v1498_v57 = vadd.f32 %v1346_v29, %v1274_v51  ;;  %v1269_v23 = vmul.f32 %v1828_v53, %v3398_v41  ;;  %v1270_v51 = vmul.f32 %v1829_v0, %v3398_v41  ;;  %v1565_v29 = vld [vmem:[%s4231_s1 + $0x40] sm:$0xff] }
 0x1e0   :  { %v1625_v30 = vadd.f32 %v1561_v17, %v1497_v43  ;;  %v1626_v42 = vadd.f32 %v1562_v13, %v1498_v57  ;;  %v1830_v17 = vld [vmem:[%s4228_s0 + $0x48] sm:$0xff]  ;;  %v1831_v57 = vld [vmem:[%s4228_s0 + $0x80] sm:$0xff] }
 0x1e1   :  { %v1341_v54 = vpop.permute.xlu0 %1340  ;;  %v1278_v13 = vmul.f32 %v1830_v17, %v3419_v28  ;;  %v1285_v41 = vmul.f32 %v1831_v57, %v3461_v1  ;;  %v1557_v28 = vld [vmem:[%s4231_s1] sm:$0xff]  ;;  %v1564_v17 = vld [vmem:[%s4231_s1 + $0x38] sm:$0xff] }
 0x1e2   :  { %1689 = vst [vmem:[%s4232_s4 + $0x20] sm:$0xff] %v1625_v30  ;;  %v3589_v52 = vpop.permute.xlu1 %1256  ;;  %v1495_v37 = vadd.f32 %v1341_v54, %v1271_v14  ;;  %v1496_v32 = vadd.f32 %v1341_v54, %v1272_v49  ;;  %v1558_v30 = vld [vmem:[%s4231_s1 + $0x8] sm:$0xff]  ;;  %v1573_v54 = vld [vmem:[%s4231_s1 + $0x80] sm:$0xff] }
 0x1e3   :  { %1690 = vst.msk [vmem:[%s4232_s4 + $0x28] sm:$0xff] %vm148_vm0, %v1626_v42  ;;  %v1832_v14 = vld [vmem:[%s4228_s0 + $0x88] sm:$0xff] }
 0x1e4   :  { %v1623_v38 = vadd.f32 %v1559_v36, %v1495_v37  ;;  %v1624_v35 = vadd.f32 %v1560_v19, %v1496_v32  ;;  %v1286_v58 = vmul.f32 %v1832_v14, %v3461_v1  ;;  %v1574_v37 = vld [vmem:[%s4231_s1 + $0x88] sm:$0xff] }
 0x1e5   :  { %v1361_v63 = vpop.permute.xlu2 %1360 }
 0x1e6   :  { %v1503_v61 = vadd.f32 %v1361_v63, %v1279_v2  ;;  %v1504_v6 = vadd.f32 %v1361_v63, %v1280_v60  ;;  %1687 = vst [vmem:[%s4232_s4 + $0x10] sm:$0xff] %v1623_v38 }
 0x1e7   :  { %1688 = vst.msk [vmem:[%s4232_s4 + $0x18] sm:$0xff] %vm148_vm0, %v1624_v35  ;;  %v1833_v35 = vld [vmem:[%s4228_s0 + $0x70] sm:$0xff] }
 0x1e8   :  { %v1631_v15 = vadd.f32 %v1567_v48, %v1503_v61  ;;  %v1632_v21 = vadd.f32 %v1568_v25, %v1504_v6  ;;  %v1283_v61 = vmul.f32 %v1833_v35, %v3402_v8  ;;  %v1834_v6 = vld [vmem:[%s4228_s0 + $0x30] sm:$0xff] }
 0x1e9   :  { %v1356_v43 = vpop.permute.xlu0 %1355 }
 0x1ea   :  { %1695 = vst [vmem:[%s4232_s4 + $0x50] sm:$0xff] %v1631_v15  ;;  %v1336_v42 = vpop.permute.xlu1 %1335  ;;  %v1501_v31 = vadd.f32 %v1356_v43, %v1277_v47  ;;  %v1502_v19 = vadd.f32 %v1356_v43, %v1278_v13  ;;  %v1275_v15 = vmul.f32 %v1834_v6, %v3364_v50  ;;  %v1836_v47 = vld [vmem:[%s4228_s0 + $0x78] sm:$0xff] }
 0x1eb   :  { %1696 = vst.msk [vmem:[%s4232_s4 + $0x58] sm:$0xff] %vm148_vm0, %v1632_v21  ;;  %v1493_v49 = vadd.f32 %v1336_v42, %v1269_v23  ;;  %v1494_v36 = vadd.f32 %v1336_v42, %v1270_v51  ;;  %v1835_v21 = vld [vmem:[%s4228_s0 + $0x38] sm:$0xff]  ;;  %v1284_v53 = vmul.f32 %v1836_v47, %v3402_v8  ;;  %v1571_v23 = vld [vmem:[%s4231_s1 + $0x70] sm:$0xff]  ;;  %v1844_v47 = vld [vmem:[%s4228_s0 + $0xe8] sm:$0xff] }
 0x1ec   :  { %v1629_v2 = vadd.f32 %v1565_v29, %v1501_v31  ;;  %v1630_v38 = vadd.f32 %v1566_v39, %v1502_v19  ;;  %v1276_v46 = vmul.f32 %v1835_v21, %v3364_v50  ;;  %v1837_v51 = vld [vmem:[%s4228_s0 + $0xb0] sm:$0xff]  ;;  %v1838_v43 = vld [vmem:[%s4228_s0 + $0xb8] sm:$0xff] }
 0x1ed   :  { %v1376_v32 = vpop.permute.xlu2 %1375  ;;  %v1621_v16 = vadd.f32 %v1557_v28, %v1493_v49  ;;  %v1622_v60 = vadd.f32 %v1558_v30, %v1494_v36  ;;  %v1291_v50 = vmul.f32 %v1837_v51, %v3484_v33  ;;  %v1563_v8 = vld [vmem:[%s4231_s1 + $0x30] sm:$0xff]  ;;  %v1292_v57 = vmul.f32 %v1838_v43, %v3484_v33  ;;  %v1580_v31 = vld [vmem:[%s4231_s1 + $0xb8] sm:$0xff] }
 0x1ee   :  { %v1509_v1 = vadd.f32 %v1376_v32, %v1285_v41  ;;  %v1510_v48 = vadd.f32 %v1376_v32, %v1286_v58  ;;  %1693 = vst [vmem:[%s4232_s4 + $0x40] sm:$0xff] %v1629_v2  ;;  %v1579_v42 = vld [vmem:[%s4231_s1 + $0xb0] sm:$0xff]  ;;  %v1572_v33 = vld [vmem:[%s4231_s1 + $0x78] sm:$0xff]  ;;  %v1839_v2 = vld [vmem:[%s4228_s0 + $0xa0] sm:$0xff] }
 0x1ef   :  { %1685 = vst [vmem:[%s4232_s4] sm:$0xff] %v1621_v16  ;;  %v1289_v16 = vmul.f32 %v1839_v2, %v3428_v45  ;;  %v1576_v2 = vld [vmem:[%s4231_s1 + $0x98] sm:$0xff] }
 0x1f0   :  { %v1637_v25 = vadd.f32 %v1573_v54, %v1509_v1  ;;  %v1638_v63 = vadd.f32 %v1574_v37, %v1510_v48  ;;  %1686 = vst.msk [vmem:[%s4232_s4 + $0x8] sm:$0xff] %vm148_vm0, %v1622_v60  ;;  %v1840_v60 = vld [vmem:[%s4228_s0 + $0xa8] sm:$0xff]  ;;  %v1841_v48 = vld [vmem:[%s4228_s0 + $0x60] sm:$0xff] }
 0x1f1   :  { %v1371_v0 = vpop.permute.xlu0 %1370  ;;  %1694 = vst.msk [vmem:[%s4232_s4 + $0x48] sm:$0xff] %vm148_vm0, %v1630_v38  ;;  %v1290_v1 = vmul.f32 %v1840_v60, %v3428_v45  ;;  %v1577_v45 = vld [vmem:[%s4231_s1 + $0xa0] sm:$0xff] }
 0x1f2   :  { %1701 = vst [vmem:[%s4232_s4 + $0x80] sm:$0xff] %v1637_v25  ;;  %v1351_v13 = vpop.permute.xlu1 %1350  ;;  %v1507_v29 = vadd.f32 %v1371_v0, %v1283_v61  ;;  %v1508_v30 = vadd.f32 %v1371_v0, %v1284_v53  ;;  %v1281_v25 = vmul.f32 %v1841_v48, %v3440_v59  ;;  %v1843_v61 = vld [vmem:[%s4228_s0 + $0xe0] sm:$0xff]  ;;  %v1298_v53 = vmul.f32 %v1844_v47, %v3505_v26 }
 0x1f3   :  { %1702 = vst.msk [vmem:[%s4232_s4 + $0x88] sm:$0xff] %vm148_vm0, %v1638_v63  ;;  %v1499_v41 = vadd.f32 %v1351_v13, %v1275_v15  ;;  %v1500_v28 = vadd.f32 %v1351_v13, %v1276_v46  ;;  %v1842_v63 = vld [vmem:[%s4228_s0 + $0x68] sm:$0xff]  ;;  %v1297_v6 = vmul.f32 %v1843_v61, %v3505_v26 }
 0x1f4   :  { %v1635_v58 = vadd.f32 %v1571_v23, %v1507_v29  ;;  %v1636_v39 = vadd.f32 %v1572_v33, %v1508_v30  ;;  %v1282_v38 = vmul.f32 %v1842_v63, %v3440_v59  ;;  %v1569_v59 = vld [vmem:[%s4231_s1 + $0x60] sm:$0xff]  ;;  %v1570_v15 = vld [vmem:[%s4231_s1 + $0x68] sm:$0xff]  ;;  %v1846_v33 = vld [vmem:[%s4228_s0 + $0xd8] sm:$0xff] }
 0x1f5   :  { %v1391_v14 = vpop.permute.xlu2 %1390  ;;  %v1627_v49 = vadd.f32 %v1563_v8, %v1499_v41  ;;  %v1628_v36 = vadd.f32 %v1564_v17, %v1500_v28  ;;  %v1586_v8 = vld [vmem:[%s4231_s1 + $0xe8] sm:$0xff] }
 0x1f6   :  { %v1515_v19 = vadd.f32 %v1391_v14, %v1291_v50  ;;  %v1516_v54 = vadd.f32 %v1391_v14, %v1292_v57  ;;  %1699 = vst [vmem:[%s4232_s4 + $0x70] sm:$0xff] %v1635_v58  ;;  %v1585_v50 = vld [vmem:[%s4231_s1 + $0xe0] sm:$0xff]  ;;  %v1578_v26 = vld [vmem:[%s4231_s1 + $0xa8] sm:$0xff]  ;;  %v1296_v58 = vmul.f32 %v1846_v33, %v3452_v12 }
 0x1f7   :  { %1691 = vst [vmem:[%s4232_s4 + $0x30] sm:$0xff] %v1627_v49  ;;  %v1847_v49 = vld [vmem:[%s4228_s0 + $0x90] sm:$0xff] }
 0x1f8   :  { %v1643_v37 = vadd.f32 %v1579_v42, %v1515_v19  ;;  %v1644_v32 = vadd.f32 %v1580_v31, %v1516_v54  ;;  %1692 = vst.msk [vmem:[%s4232_s4 + $0x38] sm:$0xff] %vm148_vm0, %v1628_v36  ;;  %v1845_v31 = vld [vmem:[%s4228_s0 + $0xd0] sm:$0xff]  ;;  %v1287_v36 = vmul.f32 %v1847_v49, %v3438_v34  ;;  %v1848_v19 = vld [vmem:[%s4228_s0 + $0x98] sm:$0xff] }
 0x1f9   :  { %v1386_v35 = vpop.permute.xlu0 %1385  ;;  %1700 = vst.msk [vmem:[%s4232_s4 + $0x78] sm:$0xff] %vm148_vm0, %v1636_v39  ;;  %v1295_v14 = vmul.f32 %v1845_v31, %v3452_v12  ;;  %v1288_v54 = vmul.f32 %v1848_v19, %v3438_v34  ;;  %v1583_v12 = vld [vmem:[%s4231_s1 + $0xd0] sm:$0xff]  ;;  %v1856_v31 = vld [vmem:[%s4228_s0 + $0x148] sm:$0xff] }
 0x1fa   :  { %1707 = vst [vmem:[%s4232_s4 + $0xb0] sm:$0xff] %v1643_v37  ;;  %v1366_v21 = vpop.permute.xlu1 %1365  ;;  %v1513_v46 = vadd.f32 %v1386_v35, %v1289_v16  ;;  %v1514_v51 = vadd.f32 %v1386_v35, %v1290_v1  ;;  %v1575_v34 = vld [vmem:[%s4231_s1 + $0x90] sm:$0xff]  ;;  %v1850_v1 = vld [vmem:[%s4228_s0 + $0x118] sm:$0xff]  ;;  %v1598_v19 = vld [vmem:[%s4231_s1 + $0x148] sm:$0xff] }
 0x1fb   :  { %1708 = vst.msk [vmem:[%s4232_s4 + $0xb8] sm:$0xff] %vm148_vm0, %v1644_v32  ;;  %v1505_v23 = vadd.f32 %v1366_v21, %v1281_v25  ;;  %v1506_v0 = vadd.f32 %v1366_v21, %v1282_v38  ;;  %v1849_v32 = vld [vmem:[%s4228_s0 + $0x110] sm:$0xff]  ;;  %v1304_v48 = vmul.f32 %v1850_v1, %v3524_v7  ;;  %v1592_v35 = vld [vmem:[%s4231_s1 + $0x118] sm:$0xff] }
 0x1fc   :  { %v1641_v13 = vadd.f32 %v1577_v45, %v1513_v46  ;;  %v1642_v42 = vadd.f32 %v1578_v26, %v1514_v51  ;;  %v1303_v39 = vmul.f32 %v1849_v32, %v3524_v7  ;;  %v1591_v45 = vld [vmem:[%s4231_s1 + $0x110] sm:$0xff]  ;;  %v1584_v7 = vld [vmem:[%s4231_s1 + $0xd8] sm:$0xff] }
 0x1fd   :  { %v1406_v17 = vpop.permute.xlu2 %1405  ;;  %v1633_v29 = vadd.f32 %v1569_v59, %v1505_v23  ;;  %v1634_v43 = vadd.f32 %v1570_v15, %v1506_v0  ;;  %v1851_v0 = vld [vmem:[%s4228_s0 + $0x100] sm:$0xff]  ;;  %v1857_v1 = vld [vmem:[%s4228_s0 + $0x130] sm:$0xff] }
 0x1fe   :  { %v1521_v57 = vadd.f32 %v1406_v17, %v1297_v6  ;;  %v1522_v41 = vadd.f32 %v1406_v17, %v1298_v53  ;;  %1705 = vst [vmem:[%s4232_s4 + $0xa0] sm:$0xff] %v1641_v13  ;;  %v1301_v51 = vmul.f32 %v1851_v0, %v3473_v3  ;;  %v1853_v17 = vld [vmem:[%s4228_s0 + $0xc0] sm:$0xff]  ;;  %v1854_v13 = vld [vmem:[%s4228_s0 + $0xc8] sm:$0xff] }
 0x1ff   :  { %1697 = vst [vmem:[%s4232_s4 + $0x60] sm:$0xff] %v1633_v29  ;;  %v1293_v26 = vmul.f32 %v1853_v17, %v3459_v24  ;;  %v1294_v29 = vmul.f32 %v1854_v13, %v3459_v24  ;;  %v1581_v24 = vld [vmem:[%s4231_s1 + $0xc0] sm:$0xff] }
 0x200   :  { %v1649_v28 = vadd.f32 %v1585_v50, %v1521_v57  ;;  %v1650_v30 = vadd.f32 %v1586_v8, %v1522_v41  ;;  %1698 = vst.msk [vmem:[%s4232_s4 + $0x68] sm:$0xff] %vm148_vm0, %v1634_v43  ;;  %v1852_v50 = vld [vmem:[%s4228_s0 + $0x108] sm:$0xff]  ;;  %v1855_v57 = vld [vmem:[%s4228_s0 + $0x140] sm:$0xff] }
 0x201   :  { %v1401_v37 = vpop.permute.xlu0 %1400  ;;  %1706 = vst.msk [vmem:[%s4232_s4 + $0xa8] sm:$0xff] %vm148_vm0, %v1642_v42  ;;  %v1302_v8 = vmul.f32 %v1852_v50, %v3473_v3  ;;  %v1589_v3 = vld [vmem:[%s4231_s1 + $0x100] sm:$0xff]  ;;  %v1309_v41 = vmul.f32 %v1855_v57, %v3540_v10  ;;  %v1603_v50 = vld [vmem:[%s4231_s1 + $0x170] sm:$0xff] }
 0x202   :  { %1713 = vst [vmem:[%s4232_s4 + $0xe0] sm:$0xff] %v1649_v28  ;;  %v1381_v16 = vpop.permute.xlu1 %1380  ;;  %v1519_v60 = vadd.f32 %v1401_v37, %v1295_v14  ;;  %v1520_v38 = vadd.f32 %v1401_v37, %v1296_v58  ;;  %v1582_v28 = vld [vmem:[%s4231_s1 + $0xc8] sm:$0xff]  ;;  %v1310_v14 = vmul.f32 %v1856_v31, %v3540_v10 }
 0x203   :  { %1714 = vst.msk [vmem:[%s4232_s4 + $0xe8] sm:$0xff] %vm148_vm0, %v1650_v30  ;;  %v1511_v25 = vadd.f32 %v1381_v16, %v1287_v36  ;;  %v1512_v63 = vadd.f32 %v1381_v16, %v1288_v54  ;;  %v1597_v36 = vld [vmem:[%s4231_s1 + $0x140] sm:$0xff]  ;;  %v1590_v10 = vld [vmem:[%s4231_s1 + $0x108] sm:$0xff] }
 0x204   :  { %v1647_v6 = vadd.f32 %v1583_v12, %v1519_v60  ;;  %v1648_v23 = vadd.f32 %v1584_v7, %v1520_v38  ;;  %v1859_v38 = vld [vmem:[%s4228_s0 + $0xf0] sm:$0xff] }
 0x205   :  { %v1421_v61 = vpop.permute.xlu2 %1420  ;;  %v1639_v59 = vadd.f32 %v1575_v34, %v1511_v25  ;;  %v1640_v15 = vadd.f32 %v1576_v2, %v1512_v63  ;;  %v1858_v25 = vld [vmem:[%s4228_s0 + $0x138] sm:$0xff] }
 0x206   :  { %v1527_v21 = vadd.f32 %v1421_v61, %v1303_v39  ;;  %v1528_v46 = vadd.f32 %v1421_v61, %v1304_v48  ;;  %1711 = vst [vmem:[%s4232_s4 + $0xd0] sm:$0xff] %v1647_v6  ;;  %v1307_v48 = vmul.f32 %v1857_v1, %v3494_v56  ;;  %v1308_v63 = vmul.f32 %v1858_v25, %v3494_v56  ;;  %v1595_v56 = vld [vmem:[%s4231_s1 + $0x130] sm:$0xff]  ;;  %v1610_v1 = vld [vmem:[%s4231_s1 + $0x1a8] sm:$0xff] }
 0x207   :  { %1703 = vst [vmem:[%s4232_s4 + $0x90] sm:$0xff] %v1639_v59  ;;  %v1861_v6 = vld [vmem:[%s4228_s0 + $0x170] sm:$0xff] }
 0x208   :  { %v1655_v47 = vadd.f32 %v1591_v45, %v1527_v21  ;;  %v1656_v53 = vadd.f32 %v1592_v35, %v1528_v46  ;;  %1704 = vst.msk [vmem:[%s4232_s4 + $0x98] sm:$0xff] %vm148_vm0, %v1640_v15  ;;  %v1299_v45 = vmul.f32 %v1859_v38, %v3480_v18  ;;  %v1860_v35 = vld [vmem:[%s4228_s0 + $0xf8] sm:$0xff]  ;;  %v1315_v59 = vmul.f32 %v1861_v6, %v3546_v11  ;;  %v1869_v6 = vld [vmem:[%s4228_s0 + $0x190] sm:$0xff] }
 0x209   :  { %v1416_v43 = vpop.permute.xlu0 %1415  ;;  %1712 = vst.msk [vmem:[%s4232_s4 + $0xd8] sm:$0xff] %vm148_vm0, %v1648_v23  ;;  %v1300_v61 = vmul.f32 %v1860_v35, %v3480_v18  ;;  %v1587_v18 = vld [vmem:[%s4231_s1 + $0xf0] sm:$0xff]  ;;  %v1588_v15 = vld [vmem:[%s4231_s1 + $0xf8] sm:$0xff] }
 0x20a   :  { %1719 = vst [vmem:[%s4232_s4 + $0x110] sm:$0xff] %v1655_v47  ;;  %v1396_v30 = vpop.permute.xlu1 %1395  ;;  %v1525_v42 = vadd.f32 %v1416_v43, %v1301_v51  ;;  %v1526_v49 = vadd.f32 %v1416_v43, %v1302_v8  ;;  %v1862_v47 = vld [vmem:[%s4228_s0 + $0x178] sm:$0xff] }
 0x20b   :  { %1720 = vst.msk [vmem:[%s4232_s4 + $0x118] sm:$0xff] %vm148_vm0, %v1656_v53  ;;  %v1517_v33 = vadd.f32 %v1396_v30, %v1293_v26  ;;  %v1518_v58 = vadd.f32 %v1396_v30, %v1294_v29  ;;  %v1316_v53 = vmul.f32 %v1862_v47, %v3546_v11  ;;  %v1604_v8 = vld [vmem:[%s4231_s1 + $0x178] sm:$0xff] }
 0x20c   :  { %v1653_v12 = vadd.f32 %v1589_v3, %v1525_v42  ;;  %v1654_v60 = vadd.f32 %v1590_v10, %v1526_v49  ;;  %v1596_v11 = vld [vmem:[%s4231_s1 + $0x138] sm:$0xff]  ;;  %v1864_v42 = vld [vmem:[%s4228_s0 + $0x168] sm:$0xff] }
 0x20d   :  { %v1436_v54 = vpop.permute.xlu2 %1435  ;;  %v1645_v37 = vadd.f32 %v1581_v24, %v1517_v33  ;;  %v1646_v32 = vadd.f32 %v1582_v28, %v1518_v58  ;;  %v1863_v28 = vld [vmem:[%s4228_s0 + $0x160] sm:$0xff]  ;;  %v1314_v31 = vmul.f32 %v1864_v42, %v3515_v40  ;;  %v1866_v58 = vld [vmem:[%s4228_s0 + $0x128] sm:$0xff]  ;;  %v1872_v47 = vld [vmem:[%s4228_s0 + $0x158] sm:$0xff] }
 0x20e   :  { %v1533_v39 = vadd.f32 %v1436_v54, %v1309_v41  ;;  %v1534_v34 = vadd.f32 %v1436_v54, %v1310_v14  ;;  %1717 = vst [vmem:[%s4232_s4 + $0x100] sm:$0xff] %v1653_v12  ;;  %v1313_v30 = vmul.f32 %v1863_v28, %v3515_v40  ;;  %v1865_v14 = vld [vmem:[%s4228_s0 + $0x120] sm:$0xff]  ;;  %v1306_v49 = vmul.f32 %v1866_v58, %v3501_v27  ;;  %v1594_v10 = vld [vmem:[%s4231_s1 + $0x128] sm:$0xff] }
 0x20f   :  { %1709 = vst [vmem:[%s4232_s4 + $0xc0] sm:$0xff] %v1645_v37  ;;  %v1305_v33 = vmul.f32 %v1865_v14, %v3501_v27  ;;  %v1601_v40 = vld [vmem:[%s4231_s1 + $0x160] sm:$0xff] }
 0x210   :  { %v1661_v2 = vadd.f32 %v1597_v36, %v1533_v39  ;;  %v1662_v16 = vadd.f32 %v1598_v19, %v1534_v34  ;;  %1710 = vst.msk [vmem:[%s4232_s4 + $0xc8] sm:$0xff] %vm148_vm0, %v1646_v32  ;;  %v1867_v19 = vld [vmem:[%s4228_s0 + $0x1a0] sm:$0xff]  ;;  %v1868_v32 = vld [vmem:[%s4228_s0 + $0x1a8] sm:$0xff] }
 0x211   :  { %v1431_v7 = vpop.permute.xlu0 %1430  ;;  %1718 = vst.msk [vmem:[%s4232_s4 + $0x108] sm:$0xff] %vm148_vm0, %v1654_v60  ;;  %v1321_v54 = vmul.f32 %v1867_v19, %v3552_v44  ;;  %v1593_v27 = vld [vmem:[%s4231_s1 + $0x120] sm:$0xff]  ;;  %v1322_v39 = vmul.f32 %v1868_v32, %v3552_v44  ;;  %v1602_v44 = vld [vmem:[%s4231_s1 + $0x168] sm:$0xff] }
 0x212   :  { %1725 = vst [vmem:[%s4232_s4 + $0x140] sm:$0xff] %v1661_v2  ;;  %v1411_v21 = vpop.permute.xlu1 %1410  ;;  %v1531_v46 = vadd.f32 %v1431_v7, %v1307_v48  ;;  %v1532_v51 = vadd.f32 %v1431_v7, %v1308_v63  ;;  %v1609_v60 = vld [vmem:[%s4231_s1 + $0x1a0] sm:$0xff] }
 0x213   :  { %1726 = vst.msk [vmem:[%s4232_s4 + $0x148] sm:$0xff] %vm148_vm0, %v1662_v16  ;;  %v1523_v23 = vadd.f32 %v1411_v21, %v1299_v45  ;;  %v1524_v0 = vadd.f32 %v1411_v21, %v1300_v61  ;;  %v1871_v21 = vld [vmem:[%s4228_s0 + $0x150] sm:$0xff]  ;;  %v1605_v32 = vld [vmem:[%s4231_s1 + $0x180] sm:$0xff] }
 0x214   :  { %v1659_v26 = vadd.f32 %v1595_v56, %v1531_v46  ;;  %v1660_v24 = vadd.f32 %v1596_v11, %v1532_v51  ;;  %v1311_v46 = vmul.f32 %v1871_v21, %v3522_v4  ;;  %v1874_v11 = vld [vmem:[%s4228_s0 + $0x1d8] sm:$0xff] }
 0x215   :  { %v1451_v17 = vpop.permute.xlu2 %1450  ;;  %v1651_v13 = vadd.f32 %v1587_v18, %v1523_v23  ;;  %v1652_v29 = vadd.f32 %v1588_v15, %v1524_v0  ;;  %v1870_v18 = vld [vmem:[%s4228_s0 + $0x198] sm:$0xff]  ;;  %v1873_v0 = vld [vmem:[%s4228_s0 + $0x1d0] sm:$0xff] }
 0x216   :  { %v1539_v3 = vadd.f32 %v1451_v17, %v1315_v59  ;;  %v1540_v43 = vadd.f32 %v1451_v17, %v1316_v53  ;;  %1723 = vst [vmem:[%s4232_s4 + $0x130] sm:$0xff] %v1659_v26  ;;  %v1319_v59 = vmul.f32 %v1869_v6, %v3531_v22  ;;  %v1320_v15 = vmul.f32 %v1870_v18, %v3531_v22  ;;  %v1607_v22 = vld [vmem:[%s4231_s1 + $0x190] sm:$0xff]  ;;  %v1882_v6 = vld [vmem:[%s4228_s0 + $0x1b8] sm:$0xff] }
 0x217   :  { %1715 = vst [vmem:[%s4232_s4 + $0xf0] sm:$0xff] %v1651_v13  ;;  %v1312_v53 = vmul.f32 %v1872_v47, %v3522_v4  ;;  %v1327_v51 = vmul.f32 %v1873_v0, %v3589_v52  ;;  %v1599_v4 = vld [vmem:[%s4231_s1 + $0x150] sm:$0xff]  ;;  %v1328_v26 = vmul.f32 %v1874_v11, %v3589_v52  ;;  %v1608_v52 = vld [vmem:[%s4231_s1 + $0x198] sm:$0xff]  ;;  %v1884_v11 = vld [vmem:[%s4228_s0 + $0x1e8] sm:$0xff] }
 0x218   :  { %v1667_v57 = vadd.f32 %v1603_v50, %v1539_v3  ;;  %v1668_v41 = vadd.f32 %v1604_v8, %v1540_v43  ;;  %1716 = vst.msk [vmem:[%s4232_s4 + $0xf8] sm:$0xff] %vm148_vm0, %v1652_v29  ;;  %v1600_v50 = vld [vmem:[%s4231_s1 + $0x158] sm:$0xff]  ;;  %v1615_v43 = vld [vmem:[%s4231_s1 + $0x1d0] sm:$0xff] }
 0x219   :  { %v1446_v36 = vpop.permute.xlu0 %1445  ;;  %1724 = vst.msk [vmem:[%s4232_s4 + $0x138] sm:$0xff] %vm148_vm0, %v1660_v24  ;;  %v1612_v21 = vld [vmem:[%s4231_s1 + $0x1b8] sm:$0xff] }
 0x21a   :  { %1731 = vst [vmem:[%s4232_s4 + $0x170] sm:$0xff] %v1667_v57  ;;  %v1426_v12 = vpop.permute.xlu1 %1425  ;;  %v1537_v37 = vadd.f32 %v1446_v36, %v1313_v30  ;;  %v1538_v16 = vadd.f32 %v1446_v36, %v1314_v31  ;;  %v1616_v57 = vld [vmem:[%s4231_s1 + $0x1d8] sm:$0xff]  ;;  %v1876_v36 = vld [vmem:[%s4228_s0 + $0x1c8] sm:$0xff] }
 0x21b   :  { %1732 = vst.msk [vmem:[%s4232_s4 + $0x178] sm:$0xff] %vm148_vm0, %v1668_v41  ;;  %v1529_v34 = vadd.f32 %v1426_v12, %v1305_v33  ;;  %v1530_v2 = vadd.f32 %v1426_v12, %v1306_v49  ;;  %v1875_v49 = vld [vmem:[%s4228_s0 + $0x1c0] sm:$0xff]  ;;  %v1326_v19 = vmul.f32 %v1876_v36, %v3542_v5 }
 0x21c   :  { %v1665_v25 = vadd.f32 %v1601_v40, %v1537_v37  ;;  %v1666_v7 = vadd.f32 %v1602_v44, %v1538_v16  ;;  %v1325_v40 = vmul.f32 %v1875_v49, %v3542_v5  ;;  %v1613_v5 = vld [vmem:[%s4231_s1 + $0x1c0] sm:$0xff] }
 0x21d   :  { %v1466_v48 = vpop.permute.xlu2 %1465  ;;  %v1657_v63 = vadd.f32 %v1593_v27, %v1529_v34  ;;  %v1658_v38 = vadd.f32 %v1594_v10, %v1530_v2  ;;  %v1878_v10 = vld [vmem:[%s4228_s0 + $0x188] sm:$0xff] }
 0x21e   :  { %v1545_v45 = vadd.f32 %v1466_v48, %v1321_v54  ;;  %v1546_v35 = vadd.f32 %v1466_v48, %v1322_v39  ;;  %1729 = vst [vmem:[%s4232_s4 + $0x160] sm:$0xff] %v1665_v25  ;;  %v1877_v54 = vld [vmem:[%s4228_s0 + $0x180] sm:$0xff]  ;;  %v1318_v12 = vmul.f32 %v1878_v10, %v3538_v9  ;;  %v1614_v34 = vld [vmem:[%s4231_s1 + $0x1c8] sm:$0xff] }
 0x21f   :  { %1721 = vst [vmem:[%s4232_s4 + $0x120] sm:$0xff] %v1657_v63  ;;  %v1317_v27 = vmul.f32 %v1877_v54, %v3538_v9  ;;  %v1606_v9 = vld [vmem:[%s4231_s1 + $0x188] sm:$0xff] }
 0x220   :  { %v1673_v61 = vadd.f32 %v1609_v60, %v1545_v45  ;;  %v1674_v56 = vadd.f32 %v1610_v1, %v1546_v35  ;;  %1722 = vst.msk [vmem:[%s4232_s4 + $0x128] sm:$0xff] %vm148_vm0, %v1658_v38  ;;  %v1879_v38 = vld [vmem:[%s4228_s0 + $0x1f0] sm:$0xff]  ;;  %v1880_v35 = vld [vmem:[%s4228_s0 + $0x1f8] sm:$0xff] }
 0x221   :  { %v1461_v23 = vpop.permute.xlu0 %1460  ;;  %1730 = vst.msk [vmem:[%s4232_s4 + $0x168] sm:$0xff] %vm148_vm0, %v1666_v7  ;;  %v1331_v45 = vmul.f32 %v1879_v38, %v3548_v62 }
 0x222   :  { %1737 = vst [vmem:[%s4232_s4 + $0x1a0] sm:$0xff] %v1673_v61  ;;  %v1441_v8 = vpop.permute.xlu1 %1440  ;;  %v1543_v17 = vadd.f32 %v1461_v23, %v1319_v59  ;;  %v1544_v3 = vadd.f32 %v1461_v23, %v1320_v15  ;;  %v1332_v61 = vmul.f32 %v1880_v35, %v3548_v62  ;;  %v1324_v59 = vmul.f32 %v1882_v6, %v3544_v55  ;;  %v1619_v62 = vld [vmem:[%s4231_s1 + $0x1f0] sm:$0xff] }
 0x223   :  { %1738 = vst.msk [vmem:[%s4232_s4 + $0x1a8] sm:$0xff] %vm148_vm0, %v1674_v56  ;;  %v1535_v13 = vadd.f32 %v1441_v8, %v1311_v46  ;;  %v1536_v29 = vadd.f32 %v1441_v8, %v1312_v53  ;;  %v1881_v56 = vld [vmem:[%s4228_s0 + $0x1b0] sm:$0xff]  ;;  %v1883_v8 = vld [vmem:[%s4228_s0 + $0x1e0] sm:$0xff] }
 0x224   :  { %v1671_v24 = vadd.f32 %v1607_v22, %v1543_v17  ;;  %v1672_v58 = vadd.f32 %v1608_v52, %v1544_v3  ;;  %v1323_v7 = vmul.f32 %v1881_v56, %v3544_v55  ;;  %v1611_v15 = vld [vmem:[%s4231_s1 + $0x1b0] sm:$0xff]  ;;  %v1620_v55 = vld [vmem:[%s4231_s1 + $0x1f8] sm:$0xff]  ;;  %v1329_v17 = vmul.f32 %v1883_v8, %v3550_v20 }
 0x225   :  { %v1481_v41 = vpop.permute.xlu2 %1480  ;;  %v1663_v28 = vadd.f32 %v1599_v4, %v1535_v13  ;;  %v1664_v30 = vadd.f32 %v1600_v50, %v1536_v29  ;;  %v1617_v13 = vld [vmem:[%s4231_s1 + $0x1e0] sm:$0xff]  ;;  %v1618_v29 = vld [vmem:[%s4231_s1 + $0x1e8] sm:$0xff] }
 0x226   :  { %v1551_v42 = vadd.f32 %v1481_v41, %v1327_v51  ;;  %v1552_v31 = vadd.f32 %v1481_v41, %v1328_v26  ;;  %1735 = vst [vmem:[%s4232_s4 + $0x190] sm:$0xff] %v1671_v24  ;;  %v1330_v26 = vmul.f32 %v1884_v11, %v3550_v20 }
 0x227   :  { %1727 = vst [vmem:[%s4232_s4 + $0x150] sm:$0xff] %v1663_v28 }
 0x228   :  { %v1679_v14 = vadd.f32 %v1615_v43, %v1551_v42  ;;  %v1680_v33 = vadd.f32 %v1616_v57, %v1552_v31  ;;  %1728 = vst.msk [vmem:[%s4232_s4 + $0x158] sm:$0xff] %vm148_vm0, %v1664_v30 }
 0x229   :  { %v1476_v37 = vpop.permute.xlu0 %1475  ;;  %1736 = vst.msk [vmem:[%s4232_s4 + $0x198] sm:$0xff] %vm148_vm0, %v1672_v58 }
 0x22a   :  { %1743 = vst [vmem:[%s4232_s4 + $0x1d0] sm:$0xff] %v1679_v14  ;;  %v1456_v39 = vpop.permute.xlu1 %1455  ;;  %v1549_v2 = vadd.f32 %v1476_v37, %v1325_v40  ;;  %v1550_v16 = vadd.f32 %v1476_v37, %v1326_v19 }
 0x22b   :  { %1744 = vst.msk [vmem:[%s4232_s4 + $0x1d8] sm:$0xff] %vm148_vm0, %v1680_v33  ;;  %v1541_v60 = vadd.f32 %v1456_v39, %v1317_v27  ;;  %v1542_v1 = vadd.f32 %v1456_v39, %v1318_v12 }
 0x22c   :  { %v1677_v48 = vadd.f32 %v1613_v5, %v1549_v2  ;;  %v1678_v63 = vadd.f32 %v1614_v34, %v1550_v16 }
 0x22d   :  { %v1669_v44 = vadd.f32 %v1605_v32, %v1541_v60  ;;  %v1670_v25 = vadd.f32 %v1606_v9, %v1542_v1 }
 0x22e   :  { %1741 = vst [vmem:[%s4232_s4 + $0x1c0] sm:$0xff] %v1677_v48 }
 0x22f   :  { %1733 = vst [vmem:[%s4232_s4 + $0x180] sm:$0xff] %v1669_v44 }
 0x230   :  { %1734 = vst.msk [vmem:[%s4232_s4 + $0x188] sm:$0xff] %vm148_vm0, %v1670_v25 }
 0x231   :  { %1742 = vst.msk [vmem:[%s4232_s4 + $0x1c8] sm:$0xff] %vm148_vm0, %v1678_v63  ;;  %v1491_v18 = vpop.permute.xlu0 %1490 }
 0x232   :  { %v1471_v46 = vpop.permute.xlu1 %1470  ;;  %v1555_v47 = vadd.f32 %v1491_v18, %v1331_v45  ;;  %v1556_v53 = vadd.f32 %v1491_v18, %v1332_v61 }
 0x233   :  { %v1547_v22 = vadd.f32 %v1471_v46, %v1323_v7  ;;  %v1548_v23 = vadd.f32 %v1471_v46, %v1324_v59 }
 0x234   :  { %v1683_v0 = vadd.f32 %v1619_v62, %v1555_v47  ;;  %v1684_v50 = vadd.f32 %v1620_v55, %v1556_v53 }
 0x235   :  { %v1675_v51 = vadd.f32 %v1611_v15, %v1547_v22  ;;  %v1676_v4 = vadd.f32 %v1612_v21, %v1548_v23 }
 0x236   :  { %1747 = vst [vmem:[%s4232_s4 + $0x1f0] sm:$0xff] %v1683_v0 }
 0x237   :  { %1739 = vst [vmem:[%s4232_s4 + $0x1b0] sm:$0xff] %v1675_v51 }
 0x238   :  { %1740 = vst.msk [vmem:[%s4232_s4 + $0x1b8] sm:$0xff] %vm148_vm0, %v1676_v4 }
 0x239   :  { %1748 = vst.msk [vmem:[%s4232_s4 + $0x1f8] sm:$0xff] %vm148_vm0, %v1684_v50 }
 0x23a   :  { %v1486_v3 = vpop.permute.xlu1 %1485 }
 0x23b   :  { %v1553_v43 = vadd.f32 %v1486_v3, %v1329_v17  ;;  %v1554_v57 = vadd.f32 %v1486_v3, %v1330_v26 }
 0x23d   :  { %v1681_v41 = vadd.f32 %v1617_v13, %v1553_v43  ;;  %v1682_v52 = vadd.f32 %v1618_v29, %v1554_v57 }
 0x23f   :  { %1745 = vst [vmem:[%s4232_s4 + $0x1e0] sm:$0xff] %v1681_v41 }
 0x240   :  { %1746 = vst.msk [vmem:[%s4232_s4 + $0x1e8] sm:$0xff] %vm148_vm0, %v1682_v52 }

</bundles_post_ra>
